<compile_context>
chip_gen: v7x
topology: tpu7x:2x2x1
jax: 0.10.0
libtpu: 0.0.40
codegen_flags: <defaults>
</compile_context>

<pallas_src>
import functools

import jax
import jax.numpy as jnp
import numpy as np
from jax.experimental import pallas as pl
from jax.experimental.pallas import tpu as pltpu

KERNEL_K = 5      # Conv1d kernel width (from CNN(embed_size, 21, embed_size, 5))
WORD_TILE = 128   # words per grid step; multiple of 128 keeps all lane slices aligned


def _tile_kernel(x_ref, wc_ref, bc_ref, wp_ref, bp_ref, wg_ref, bg_ref, o_ref,
                 *, lw, w):
    # x_ref : (E, lw*w)  bf16, column index = char_pos * w + word   (char-major)
    # wc_ref: (K, E, E)  bf16, wc_ref[k] = conv tap k as (out_ch, in_ch)
    # bc_ref: (E, 1)     f32 conv bias
    # wp_ref/wg_ref: (E, E) bf16 highway weights (out, in); bp_ref/bg_ref: (E, 1) f32
    # o_ref : (E, w)     f32 word embeddings for this tile (transposed)
    l_out = lw - KERNEL_K + 1
    m = l_out * w
    xb = x_ref[...]                                   # (E, lw*w) bf16

    # Conv1d(k=5) as 5 shifted (E,E) x (E, l_out*w) MXU matmuls, f32 accumulate.
    acc = jnp.dot(wc_ref[0], xb[:, 0:m], preferred_element_type=jnp.float32)
    for k in range(1, KERNEL_K):
        acc = acc + jnp.dot(wc_ref[k], xb[:, k * w:k * w + m],
                            preferred_element_type=jnp.float32)
    conv = jnp.maximum(acc + bc_ref[...], 0.0)        # ReLU         (E, l_out*w)

    # Max-pool over char positions: columns [t*w, (t+1)*w) hold position t.
    pooled = conv[:, 0:w]
    for t in range(1, l_out):
        pooled = jnp.maximum(pooled, conv[:, t * w:(t + 1) * w])   # (E, w) f32

    # Highway: out = g * relu(W_p x + b_p) + (1 - g) * x,  g = sigmoid(W_g x + b_g)
    ph = pooled.astype(jnp.bfloat16)
    proj = jnp.maximum(
        jnp.dot(wp_ref[...], ph, preferred_element_type=jnp.float32) + bp_ref[...], 0.0)
    gate = jax.nn.sigmoid(
        jnp.dot(wg_ref[...], ph, preferred_element_type=jnp.float32) + bg_ref[...])

    # TODO(synk): nn.Dropout(0.3) is identity in eval mode; training-mode random
    # masking (pltpu.prng_seed / stateful_bernoulli) intentionally omitted.
    o_ref[...] = (gate * proj + (1.0 - gate) * pooled).astype(o_ref.dtype)


def model_embeddings_forward(char_ids, params, *, word_tile=WORD_TILE):
    """char_ids: (sentence_len S, batch B, max_word_len Lw) int32
       returns : (S, B, E) float32"""
    S, B, Lw = char_ids.shape
    E = params["emb"].shape[1]
    assert Lw >= KERNEL_K, "max_word_length must be >= conv kernel width (5)"
    N = S * B
    W = word_tile
    nb = (N + W - 1) // W
    n_pad = nb * W

    # Embedding gather in bf16 (halves the largest HBM intermediate); pad word tail.
    x = params["emb"].astype(jnp.bfloat16)[char_ids.reshape(N, Lw)]     # (N, Lw, E)
    x = jnp.pad(x, ((0, n_pad - N), (0, 0), (0, 0)))
    # Lane-dense, char-major layout: xt[e, (blk*Lw + j)*W + w] = x[blk*W + w, j, e]
    xt = (x.reshape(nb, W, Lw, E)
           .transpose(3, 0, 2, 1)
           .reshape(E, nb * Lw * W))

    wc_t = jnp.swapaxes(params["w_conv"], 1, 2).astype(jnp.bfloat16)    # (K, Eout, Ein)
    wp_t = params["w_proj"].T.astype(jnp.bfloat16)
    wg_t = params["w_gate"].T.astype(jnp.bfloat16)
    bc_t = params["b_conv"].T.astype(jnp.float32)                       # (E, 1)
    bp_t = params["b_proj"].T.astype(jnp.float32)
    bg_t = params["b_gate"].T.astype(jnp.float32)

    kernel = functools.partial(_tile_kernel, lw=Lw, w=W)
    out = pl.pallas_call(
        kernel,
        out_shape=jax.ShapeDtypeStruct((E, n_pad), jnp.float32),
        grid_spec=pltpu.PrefetchScalarGridSpec(
            num_scalar_prefetch=0,
            grid=(nb,),
            in_specs=[
                pl.BlockSpec((E, Lw * W), lambda i: (0, i)),            # x word-tile
                pl.BlockSpec((KERNEL_K, E, E), lambda i: (0, 0, 0)),    # conv W (resident)
                pl.BlockSpec((E, 1), lambda i: (0, 0)),                 # conv b
                pl.BlockSpec((E, E), lambda i: (0, 0)),                 # highway W_proj
                pl.BlockSpec((E, 1), lambda i: (0, 0)),                 # highway b_proj
                pl.BlockSpec((E, E), lambda i: (0, 0)),                 # highway W_gate
                pl.BlockSpec((E, 1), lambda i: (0, 0)),                 # highway b_gate
            ],
            out_specs=pl.BlockSpec((E, W), lambda i: (0, i)),
        ),
        compiler_params=pltpu.CompilerParams(
            dimension_semantics=("parallel",)),   # independent word tiles (v7x 2 TCs)
    )(xt, wc_t, bc_t, wp_t, bp_t, wg_t, bg_t)

    return out.T[:N].reshape(S, B, E)


def reference_forward(char_ids, params):
    """Pure-JAX reference mirroring the kernel math (bf16 matmul inputs, f32 accum)."""
    S, B, Lw = char_ids.shape
    E = params["emb"].shape[1]
    x = params["emb"].astype(jnp.bfloat16)[char_ids].reshape(S * B, Lw, E)
    L_out = Lw - KERNEL_K + 1
    wc = params["w_conv"].astype(jnp.bfloat16)
    acc = jnp.zeros((S * B, L_out, E), jnp.float32)
    for k in range(KERNEL_K):
        acc = acc + jnp.einsum("nle,eo->nlo", x[:, k:k + L_out, :], wc[k],
                               preferred_element_type=jnp.float32)
    conv = jnp.maximum(acc + params["b_conv"][None], 0.0)
    pooled = jnp.max(conv, axis=1)                                      # (N, E) f32
    ph = pooled.astype(jnp.bfloat16)
    proj = jnp.maximum(
        jnp.dot(ph, params["w_proj"].astype(jnp.bfloat16),
                preferred_element_type=jnp.float32) + params["b_proj"], 0.0)
    gate = jax.nn.sigmoid(
        jnp.dot(ph, params["w_gate"].astype(jnp.bfloat16),
                preferred_element_type=jnp.float32) + params["b_gate"])
    out = gate * proj + (1.0 - gate) * pooled
    return out.reshape(S, B, E)


def init_params(key, vocab_size, embed_size, pad_idx):
    ks = jax.random.split(key, 7)
    emb = 0.1 * jax.random.normal(ks[0], (vocab_size, embed_size), jnp.float32)
    emb = emb.at[pad_idx].set(0.0)                 # padding_idx => zero row
    return {
        "emb": emb,
        "w_conv": 0.1 * jax.random.normal(ks[1], (KERNEL_K, embed_size, embed_size), jnp.float32),
        "b_conv": 0.1 * jax.random.normal(ks[2], (1, embed_size), jnp.float32),
        "w_proj": 0.1 * jax.random.normal(ks[3], (embed_size, embed_size), jnp.float32),
        "b_proj": 0.1 * jax.random.normal(ks[4], (1, embed_size), jnp.float32),
        "w_gate": 0.1 * jax.random.normal(ks[5], (embed_size, embed_size), jnp.float32),
        "b_gate": 0.1 * jax.random.normal(ks[6], (1, embed_size), jnp.float32),
    }


if __name__ == "__main__":
    S, B, Lw, E, V, PAD = 4, 2, 21, 32, 30, 0      # Lw=21 matches CNN(embed_size, 21, ...)

    key = jax.random.PRNGKey(0)
    k_par, k_ids = jax.random.split(key)
    params = init_params(k_par, V, E, PAD)
    char_ids = jax.random.randint(k_ids, (S, B, Lw), 0, V, dtype=jnp.int32)

    out = jax.block_until_ready(model_embeddings_forward(char_ids, params))
    ref = jax.block_until_ready(reference_forward(char_ids, params))

    assert out.shape == (S, B, E)
    assert np.allclose(np.asarray(out), np.asarray(ref), atol=2e-3, rtol=2e-3)
    print("KERNEL_OK")
</pallas_src>

<mosaic_0001>
module attributes {stable_mosaic.version = 11 : i64} {
  func.func @_tile_kernel(%arg0: i32, %arg1: memref<32x2688xbf16, #tpu.memory_space<vmem>>, %arg2: memref<5x32x32xbf16, #tpu.memory_space<vmem>>, %arg3: memref<32x1xf32, #tpu.memory_space<vmem>>, %arg4: memref<32x32xbf16, #tpu.memory_space<vmem>>, %arg5: memref<32x1xf32, #tpu.memory_space<vmem>>, %arg6: memref<32x32xbf16, #tpu.memory_space<vmem>>, %arg7: memref<32x1xf32, #tpu.memory_space<vmem>>, %arg8: memref<32x128xf32, #tpu.memory_space<vmem>>) attributes {dimension_semantics = [#tpu.dimension_semantics<parallel>], iteration_bounds = array<i64: 1>, scalar_prefetch = 0 : i64, scratch_operands = 0 : i64, tpu.core_type = #tpu.core_type<tc>, window_params = [{transform_indices = @transform_0, window_bounds = array<i64: 32, 2688>}, {pipeline_mode = #tpu.pipeline_mode<synchronous>, transform_indices = @transform_1, window_bounds = array<i64: 5, 32, 32>}, {pipeline_mode = #tpu.pipeline_mode<synchronous>, transform_indices = @transform_2, window_bounds = array<i64: 32, 1>}, {pipeline_mode = #tpu.pipeline_mode<synchronous>, transform_indices = @transform_3, window_bounds = array<i64: 32, 32>}, {pipeline_mode = #tpu.pipeline_mode<synchronous>, transform_indices = @transform_4, window_bounds = array<i64: 32, 1>}, {pipeline_mode = #tpu.pipeline_mode<synchronous>, transform_indices = @transform_5, window_bounds = array<i64: 32, 32>}, {pipeline_mode = #tpu.pipeline_mode<synchronous>, transform_indices = @transform_6, window_bounds = array<i64: 32, 1>}, {transform_indices = @transform_7, window_bounds = array<i64: 32, 128>}]} {
    %c0 = arith.constant 0 : index
    %c0_0 = arith.constant 0 : index
    %0 = vector.load %arg1[%c0, %c0_0] : memref<32x2688xbf16, #tpu.memory_space<vmem>>, vector<32x2688xbf16>
    %c0_1 = arith.constant 0 : index
    %c0_2 = arith.constant 0 : index
    %c0_3 = arith.constant 0 : index
    %1 = vector.load %arg2[%c0_1, %c0_2, %c0_3] : memref<5x32x32xbf16, #tpu.memory_space<vmem>>, vector<1x32x32xbf16>
    %2 = vector.shape_cast %1 : vector<1x32x32xbf16> to vector<32x32xbf16>
    %3 = vector.extract_strided_slice %0 {offsets = [0, 0], sizes = [32, 2176], strides = [1, 1]} : vector<32x2688xbf16> to vector<32x2176xbf16>
    %cst = arith.constant dense<0.000000e+00> : vector<32x2176xf32>
    %4 = tpu.matmul %2, %3, %cst {dimension_numbers = #tpu.dot_dimension_numbers<[1], [0], [0], [1], [0, 0, 1, 1], [], []>} : vector<32x32xbf16>, vector<32x2176xbf16>, vector<32x2176xf32> -> vector<32x2176xf32>
    %c1 = arith.constant 1 : index
    %c0_4 = arith.constant 0 : index
    %c0_5 = arith.constant 0 : index
    %5 = vector.load %arg2[%c1, %c0_4, %c0_5] : memref<5x32x32xbf16, #tpu.memory_space<vmem>>, vector<1x32x32xbf16>
    %6 = vector.shape_cast %5 : vector<1x32x32xbf16> to vector<32x32xbf16>
    %7 = vector.extract_strided_slice %0 {offsets = [0, 128], sizes = [32, 2176], strides = [1, 1]} : vector<32x2688xbf16> to vector<32x2176xbf16>
    %cst_6 = arith.constant dense<0.000000e+00> : vector<32x2176xf32>
    %8 = tpu.matmul %6, %7, %cst_6 {dimension_numbers = #tpu.dot_dimension_numbers<[1], [0], [0], [1], [0, 0, 1, 1], [], []>} : vector<32x32xbf16>, vector<32x2176xbf16>, vector<32x2176xf32> -> vector<32x2176xf32>
    %9 = arith.addf %4, %8 : vector<32x2176xf32>
    %c2 = arith.constant 2 : index
    %c0_7 = arith.constant 0 : index
    %c0_8 = arith.constant 0 : index
    %10 = vector.load %arg2[%c2, %c0_7, %c0_8] : memref<5x32x32xbf16, #tpu.memory_space<vmem>>, vector<1x32x32xbf16>
    %11 = vector.shape_cast %10 : vector<1x32x32xbf16> to vector<32x32xbf16>
    %12 = vector.extract_strided_slice %0 {offsets = [0, 256], sizes = [32, 2176], strides = [1, 1]} : vector<32x2688xbf16> to vector<32x2176xbf16>
    %cst_9 = arith.constant dense<0.000000e+00> : vector<32x2176xf32>
    %13 = tpu.matmul %11, %12, %cst_9 {dimension_numbers = #tpu.dot_dimension_numbers<[1], [0], [0], [1], [0, 0, 1, 1], [], []>} : vector<32x32xbf16>, vector<32x2176xbf16>, vector<32x2176xf32> -> vector<32x2176xf32>
    %14 = arith.addf %9, %13 : vector<32x2176xf32>
    %c3 = arith.constant 3 : index
    %c0_10 = arith.constant 0 : index
    %c0_11 = arith.constant 0 : index
    %15 = vector.load %arg2[%c3, %c0_10, %c0_11] : memref<5x32x32xbf16, #tpu.memory_space<vmem>>, vector<1x32x32xbf16>
    %16 = vector.shape_cast %15 : vector<1x32x32xbf16> to vector<32x32xbf16>
    %17 = vector.extract_strided_slice %0 {offsets = [0, 384], sizes = [32, 2176], strides = [1, 1]} : vector<32x2688xbf16> to vector<32x2176xbf16>
    %cst_12 = arith.constant dense<0.000000e+00> : vector<32x2176xf32>
    %18 = tpu.matmul %16, %17, %cst_12 {dimension_numbers = #tpu.dot_dimension_numbers<[1], [0], [0], [1], [0, 0, 1, 1], [], []>} : vector<32x32xbf16>, vector<32x2176xbf16>, vector<32x2176xf32> -> vector<32x2176xf32>
    %19 = arith.addf %14, %18 : vector<32x2176xf32>
    %c4 = arith.constant 4 : index
    %c0_13 = arith.constant 0 : index
    %c0_14 = arith.constant 0 : index
    %20 = vector.load %arg2[%c4, %c0_13, %c0_14] : memref<5x32x32xbf16, #tpu.memory_space<vmem>>, vector<1x32x32xbf16>
    %21 = vector.shape_cast %20 : vector<1x32x32xbf16> to vector<32x32xbf16>
    %22 = vector.extract_strided_slice %0 {offsets = [0, 512], sizes = [32, 2176], strides = [1, 1]} : vector<32x2688xbf16> to vector<32x2176xbf16>
    %cst_15 = arith.constant dense<0.000000e+00> : vector<32x2176xf32>
    %23 = tpu.matmul %21, %22, %cst_15 {dimension_numbers = #tpu.dot_dimension_numbers<[1], [0], [0], [1], [0, 0, 1, 1], [], []>} : vector<32x32xbf16>, vector<32x2176xbf16>, vector<32x2176xf32> -> vector<32x2176xf32>
    %24 = arith.addf %19, %23 : vector<32x2176xf32>
    %c0_16 = arith.constant 0 : index
    %c0_17 = arith.constant 0 : index
    %25 = vector.load %arg3[%c0_16, %c0_17] : memref<32x1xf32, #tpu.memory_space<vmem>>, vector<32x1xf32>
    %26 = vector.broadcast %25 : vector<32x1xf32> to vector<32x2176xf32>
    %27 = arith.addf %24, %26 : vector<32x2176xf32>
    %cst_18 = arith.constant 0.000000e+00 : f32
    %28 = vector.broadcast %cst_18 : f32 to vector<32x2176xf32>
    %29 = arith.maximumf %27, %28 : vector<32x2176xf32>
    %30 = vector.extract_strided_slice %29 {offsets = [0, 0], sizes = [32, 128], strides = [1, 1]} : vector<32x2176xf32> to vector<32x128xf32>
    %31 = vector.extract_strided_slice %29 {offsets = [0, 128], sizes = [32, 128], strides = [1, 1]} : vector<32x2176xf32> to vector<32x128xf32>
    %32 = arith.maximumf %30, %31 : vector<32x128xf32>
    %33 = vector.extract_strided_slice %29 {offsets = [0, 256], sizes = [32, 128], strides = [1, 1]} : vector<32x2176xf32> to vector<32x128xf32>
    %34 = arith.maximumf %32, %33 : vector<32x128xf32>
    %35 = vector.extract_strided_slice %29 {offsets = [0, 384], sizes = [32, 128], strides = [1, 1]} : vector<32x2176xf32> to vector<32x128xf32>
    %36 = arith.maximumf %34, %35 : vector<32x128xf32>
    %37 = vector.extract_strided_slice %29 {offsets = [0, 512], sizes = [32, 128], strides = [1, 1]} : vector<32x2176xf32> to vector<32x128xf32>
    %38 = arith.maximumf %36, %37 : vector<32x128xf32>
    %39 = vector.extract_strided_slice %29 {offsets = [0, 640], sizes = [32, 128], strides = [1, 1]} : vector<32x2176xf32> to vector<32x128xf32>
    %40 = arith.maximumf %38, %39 : vector<32x128xf32>
    %41 = vector.extract_strided_slice %29 {offsets = [0, 768], sizes = [32, 128], strides = [1, 1]} : vector<32x2176xf32> to vector<32x128xf32>
    %42 = arith.maximumf %40, %41 : vector<32x128xf32>
    %43 = vector.extract_strided_slice %29 {offsets = [0, 896], sizes = [32, 128], strides = [1, 1]} : vector<32x2176xf32> to vector<32x128xf32>
    %44 = arith.maximumf %42, %43 : vector<32x128xf32>
    %45 = vector.extract_strided_slice %29 {offsets = [0, 1024], sizes = [32, 128], strides = [1, 1]} : vector<32x2176xf32> to vector<32x128xf32>
    %46 = arith.maximumf %44, %45 : vector<32x128xf32>
    %47 = vector.extract_strided_slice %29 {offsets = [0, 1152], sizes = [32, 128], strides = [1, 1]} : vector<32x2176xf32> to vector<32x128xf32>
    %48 = arith.maximumf %46, %47 : vector<32x128xf32>
    %49 = vector.extract_strided_slice %29 {offsets = [0, 1280], sizes = [32, 128], strides = [1, 1]} : vector<32x2176xf32> to vector<32x128xf32>
    %50 = arith.maximumf %48, %49 : vector<32x128xf32>
    %51 = vector.extract_strided_slice %29 {offsets = [0, 1408], sizes = [32, 128], strides = [1, 1]} : vector<32x2176xf32> to vector<32x128xf32>
    %52 = arith.maximumf %50, %51 : vector<32x128xf32>
    %53 = vector.extract_strided_slice %29 {offsets = [0, 1536], sizes = [32, 128], strides = [1, 1]} : vector<32x2176xf32> to vector<32x128xf32>
    %54 = arith.maximumf %52, %53 : vector<32x128xf32>
    %55 = vector.extract_strided_slice %29 {offsets = [0, 1664], sizes = [32, 128], strides = [1, 1]} : vector<32x2176xf32> to vector<32x128xf32>
    %56 = arith.maximumf %54, %55 : vector<32x128xf32>
    %57 = vector.extract_strided_slice %29 {offsets = [0, 1792], sizes = [32, 128], strides = [1, 1]} : vector<32x2176xf32> to vector<32x128xf32>
    %58 = arith.maximumf %56, %57 : vector<32x128xf32>
    %59 = vector.extract_strided_slice %29 {offsets = [0, 1920], sizes = [32, 128], strides = [1, 1]} : vector<32x2176xf32> to vector<32x128xf32>
    %60 = arith.maximumf %58, %59 : vector<32x128xf32>
    %61 = vector.extract_strided_slice %29 {offsets = [0, 2048], sizes = [32, 128], strides = [1, 1]} : vector<32x2176xf32> to vector<32x128xf32>
    %62 = arith.maximumf %60, %61 : vector<32x128xf32>
    %63 = arith.truncf %62 : vector<32x128xf32> to vector<32x128xbf16>
    %c0_19 = arith.constant 0 : index
    %c0_20 = arith.constant 0 : index
    %64 = vector.load %arg4[%c0_19, %c0_20] : memref<32x32xbf16, #tpu.memory_space<vmem>>, vector<32x32xbf16>
    %cst_21 = arith.constant dense<0.000000e+00> : vector<32x128xf32>
    %65 = tpu.matmul %64, %63, %cst_21 {dimension_numbers = #tpu.dot_dimension_numbers<[1], [0], [0], [1], [0, 0, 1, 1], [], []>} : vector<32x32xbf16>, vector<32x128xbf16>, vector<32x128xf32> -> vector<32x128xf32>
    %c0_22 = arith.constant 0 : index
    %c0_23 = arith.constant 0 : index
    %66 = vector.load %arg5[%c0_22, %c0_23] : memref<32x1xf32, #tpu.memory_space<vmem>>, vector<32x1xf32>
    %67 = vector.broadcast %66 : vector<32x1xf32> to vector<32x128xf32>
    %68 = arith.addf %65, %67 : vector<32x128xf32>
    %cst_24 = arith.constant 0.000000e+00 : f32
    %69 = vector.broadcast %cst_24 : f32 to vector<32x128xf32>
    %70 = arith.maximumf %68, %69 : vector<32x128xf32>
    %c0_25 = arith.constant 0 : index
    %c0_26 = arith.constant 0 : index
    %71 = vector.load %arg6[%c0_25, %c0_26] : memref<32x32xbf16, #tpu.memory_space<vmem>>, vector<32x32xbf16>
    %cst_27 = arith.constant dense<0.000000e+00> : vector<32x128xf32>
    %72 = tpu.matmul %71, %63, %cst_27 {dimension_numbers = #tpu.dot_dimension_numbers<[1], [0], [0], [1], [0, 0, 1, 1], [], []>} : vector<32x32xbf16>, vector<32x128xbf16>, vector<32x128xf32> -> vector<32x128xf32>
    %c0_28 = arith.constant 0 : index
    %c0_29 = arith.constant 0 : index
    %73 = vector.load %arg7[%c0_28, %c0_29] : memref<32x1xf32, #tpu.memory_space<vmem>>, vector<32x1xf32>
    %74 = vector.broadcast %73 : vector<32x1xf32> to vector<32x128xf32>
    %75 = arith.addf %72, %74 : vector<32x128xf32>
    %76 = arith.negf %75 : vector<32x128xf32>
    %77 = math.exp %76 : vector<32x128xf32>
    %cst_30 = arith.constant 1.000000e+00 : f32
    %78 = vector.broadcast %cst_30 : f32 to vector<32x128xf32>
    %79 = arith.addf %78, %77 : vector<32x128xf32>
    %80 = arith.divf %78, %79 : vector<32x128xf32>
    %81 = arith.mulf %80, %70 : vector<32x128xf32>
    %cst_31 = arith.constant 1.000000e+00 : f32
    %82 = vector.broadcast %cst_31 : f32 to vector<32x128xf32>
    %83 = arith.subf %82, %80 : vector<32x128xf32>
    %84 = arith.mulf %83, %62 : vector<32x128xf32>
    %85 = arith.addf %81, %84 : vector<32x128xf32>
    %c0_32 = arith.constant 0 : index
    %c0_33 = arith.constant 0 : index
    %86 = vector.load %arg8[%c0_32, %c0_33] : memref<32x128xf32, #tpu.memory_space<vmem>>, vector<32x128xf32>
    tpu.vector_store %arg8[%c0_32, %c0_33], %85 {strides = array<i32>} : memref<32x128xf32, #tpu.memory_space<vmem>>, vector<32x128xf32>,
    return
  }
  func.func @transform_0(%arg0: i32) -> (i32, i32) {
    %c0_i32 = arith.constant 0 : i32
    %c0_i32_0 = arith.constant 0 : i32
    return %c0_i32, %arg0 : i32, i32
  }
  func.func @transform_1(%arg0: i32) -> (i32, i32, i32) {
    %c0_i32 = arith.constant 0 : i32
    %c0_i32_0 = arith.constant 0 : i32
    %c0_i32_1 = arith.constant 0 : i32
    %c0_i32_2 = arith.constant 0 : i32
    return %c0_i32, %c0_i32_0, %c0_i32_1 : i32, i32, i32
  }
  func.func @transform_2(%arg0: i32) -> (i32, i32) {
    %c0_i32 = arith.constant 0 : i32
    %c0_i32_0 = arith.constant 0 : i32
    %c0_i32_1 = arith.constant 0 : i32
    return %c0_i32, %c0_i32_0 : i32, i32
  }
  func.func @transform_3(%arg0: i32) -> (i32, i32) {
    %c0_i32 = arith.constant 0 : i32
    %c0_i32_0 = arith.constant 0 : i32
    %c0_i32_1 = arith.constant 0 : i32
    return %c0_i32, %c0_i32_0 : i32, i32
  }
  func.func @transform_4(%arg0: i32) -> (i32, i32) {
    %c0_i32 = arith.constant 0 : i32
    %c0_i32_0 = arith.constant 0 : i32
    %c0_i32_1 = arith.constant 0 : i32
    return %c0_i32, %c0_i32_0 : i32, i32
  }
  func.func @transform_5(%arg0: i32) -> (i32, i32) {
    %c0_i32 = arith.constant 0 : i32
    %c0_i32_0 = arith.constant 0 : i32
    %c0_i32_1 = arith.constant 0 : i32
    return %c0_i32, %c0_i32_0 : i32, i32
  }
  func.func @transform_6(%arg0: i32) -> (i32, i32) {
    %c0_i32 = arith.constant 0 : i32
    %c0_i32_0 = arith.constant 0 : i32
    %c0_i32_1 = arith.constant 0 : i32
    return %c0_i32, %c0_i32_0 : i32, i32
  }
  func.func @transform_7(%arg0: i32) -> (i32, i32) {
    %c0_i32 = arith.constant 0 : i32
    %c0_i32_0 = arith.constant 0 : i32
    return %c0_i32, %arg0 : i32, i32
  }
}

</mosaic_0001>

<bundles_post_ra>
// kernel: tpu_custom_call.1
= control target key start
LH: loop header
LB: loop body
LE: loop exit
PB: predicated region body
PF: predicated region fallthrough
CT: control target
= control target key end

     0   :  { %12 = vsyncpa [#allocation3], 0  ;;  %s4898_s0 = inlined_call_operand.hbm [shape: bf16[32,2688], index: 0, kind: input, shape index: {}]   ;;  %s4899_s1 = inlined_call_operand.vmem [shape: bf16[5,32,32], index: 1, kind: input, shape index: {}]   ;;  %s4900_s2 = inlined_call_operand.vmem [shape: f32[32,1], index: 2, kind: input, shape index: {}]   ;;  %s4901_s3 = inlined_call_operand.vmem [shape: bf16[32,32], index: 3, kind: input, shape index: {}]   ;;  %s4902_s4 = inlined_call_operand.vmem [shape: f32[32,1], index: 4, kind: input, shape index: {}]   ;;  %s4903_s5 = inlined_call_operand.vmem [shape: bf16[32,32], index: 5, kind: input, shape index: {}]   ;;  %s4904_s6 = inlined_call_operand.vmem [shape: f32[32,1], index: 6, kind: input, shape index: {}]   ;;  %s4905_s7 = inlined_call_operand.hbm [shape: f32[32,128], index: 7, kind: output, shape index: {}]  }
   0x1   :  { %13 = vsyncpa [#allocation4], 0  ;;  %s4124_s24 = smov [#allocation2]   ;;  %s4076_s28 = scalar_lea.hbm %s4898_s0, 5376 }
   0x2   :  { %s19_s25 = sshll.u32 %s4124_s24, 4  ;;  %p4077_p0 = scmp.ne.s32.totalorder %s4898_s0, %s4076_s28  ;;  %s20_s25 = int_to_ptr.vmem [resolvable:$true] %s19_s25 }
   0x3   :  { %p4080_p1 = scmp.lt.u32.totalorder %s4076_s28, %s4898_s0 }
   0x5   :  { %p4082_p2 = pnand %p4080_p1, %p4077_p0 }
   0x7   :  { %4085 = shalt.err (!%p4082_p2)
}
   0x8   :  { %s4086_s10 = scalar_lea.vmem %s20_s25, 5376  ;;  %p4091_p4 = scmp.lt.s32.totalorder %s20_s25, %s20_s25 }
   0x9   :  { %p4087_p3 = scmp.ne.s32.totalorder %s20_s25, %s4086_s10  ;;  %p4092_p5 = scmp.lt.s32.totalorder %s4086_s10, %s4086_s10 }
   0xb   :  { %p4093_p6 = por %p4092_p5, %p4091_p4 }
   0xd   :  { %p4094_p7 = pnand %p4093_p6, %p4087_p3 }
   0xf   :  { %4097 = shalt.err (!%p4094_p7)
}
  0x10   :  { %s4125_s11 = smov 1344   ;;  %s4126_s12 = smov 84  }
  0x11   :  { %25 = dma.hbm_to_vmem [thread:$0]  %s4898_s0, 5376, %s20_s25, [#allocation3], %s4125_s11, %s4125_s11, %s4126_s12  }
  0x12   :  { %4120 = dma.done.wait [#allocation3], 5376  }
  0x13   :  { %4121 = vsyncadd [#allocation3], 4294961920  ;;  %v4127_v0 = vmov 0   ;;  %v4187_v1 = vld [vmem:[#allocation2 + $0x8] ss:$84 sps:$4 sm:$0xff]   ;;  %vm277_vm0 = vcmask 261120  }
  0x14   :  { %316 = vmatprep.mubr.bf16.mxu1 %v4127_v0  ;;  %422 = vmatprep.mubr.bf16.mxu0 %v4127_v0  ;;  %v4190_v2 = vld [vmem:[#allocation2 + $0x18] ss:$84 sps:$4 sm:$0xff]   ;;  %v4195_v4 = vld [vmem:[#allocation2 + $0x14] ss:$84 sps:$4 sm:$0xff]   ;;  %v4198_v5 = vld [vmem:[#allocation2 + $0xb0] ss:$84 sps:$4 sm:$0xff]  }
  0x15   :  { %3982 = vset.pattern.permute.xlu0 %v4127_v0  ;;  %3983 = vset.pattern.permute.xlu1 %v4127_v0  ;;  %v4192_v3 = vld [vmem:[#allocation2 + $0x4] ss:$84 sps:$4 sm:$0xff]   ;;  %v4201_v6 = vld [vmem:[#allocation2 + $0xc0] ss:$84 sps:$4 sm:$0xff]   ;;  %v4208_v8 = vld [vmem:[#allocation2 + $0xbc] ss:$84 sps:$4 sm:$0xff]  }
  0x16   :  { %284 = vmatprep.subr.bf16.mxu1 %v4187_v1  ;;  %390 = vmatprep.subr.bf16.mxu0 %v4190_v2  ;;  %v4204_v7 = vld [vmem:[#allocation2 + $0xac] ss:$84 sps:$4 sm:$0xff]   ;;  %v4213_v9 = vld [vmem:[%s4899_s1 + $0x10] sm:$0xff]   ;;  %v4222_v12 = vld [vmem:[#allocation2 + $0x28] ss:$84 sps:$4 sm:$0xff]  }
  0x17   :  { %285 = vmatpush1.bf16.msra.mxu1 %v4192_v3  ;;  %391 = vmatpush1.bf16.msra.mxu0 %v4195_v4  ;;  %v4215_v10 = vld [vmem:[#allocation2 + $0xc] ss:$84 sps:$4 sm:$0xff]   ;;  %v4218_v11 = vld [vmem:[#allocation2 + $0x10] ss:$84 sps:$4 sm:$0xff]   ;;  %v4224_v13 = vld [vmem:[#allocation2 + $0xb4] ss:$84 sps:$4 sm:$0xff]  }
  0x18   :  { %286 = vmatprep.subr.bf16.mxu1 %v4198_v5  ;;  %392 = vmatprep.subr.bf16.mxu0 %v4201_v6  ;;  %v4228_v14 = vld [vmem:[#allocation2 + $0x24] ss:$84 sps:$4 sm:$0xff]   ;;  %v4246_v18 = vld [vmem:[#allocation2 + $0xcc] ss:$84 sps:$4 sm:$0xff]   ;;  %v4263_v21 = vld [vmem:[#allocation2 + $0x1c] ss:$84 sps:$4 sm:$0xff]  }
  0x19   :  { %v4230_v15 = vld [vmem:[#allocation2 + $0xb8] ss:$84 sps:$4 sm:$0xff]   ;;  %v4235_v16 = vld [vmem:[#allocation2 + $0xd0] ss:$84 sps:$4 sm:$0xff]   ;;  %v4249_v19 = vld [vmem:[#allocation2 + $0x20] ss:$84 sps:$4 sm:$0xff]  }
  0x1a   :  { %v4241_v17 = vld [vmem:[%s4899_s1 + $0x18] sm:$0xff]   ;;  %v4265_v22 = vld [vmem:[#allocation2 + $0x34] ss:$84 sps:$4 sm:$0xff]   ;;  %v4279_v27 = vld [vmem:[#allocation2 + $0x30] ss:$84 sps:$4 sm:$0xff]  }
  0x1b   :  { %287 = vmatpush1.bf16.msra.mxu1 %v4204_v7  ;;  %393 = vmatpush1.bf16.msra.mxu0 %v4208_v8  ;;  %v4251_v20 = vld [vmem:[#allocation2 + $0x38] ss:$84 sps:$4 sm:$0xff]   ;;  %v4267_v23 = vld [vmem:[#allocation2 + $0xc8] ss:$84 sps:$4 sm:$0xff]   ;;  %v4269_v24 = vld [vmem:[#allocation2 + $0xe0] ss:$84 sps:$4 sm:$0xff]  }
  0x1c   :  { %337 = vmatprep.subr.bf16.mxu1 %v4218_v11  ;;  %496 = vmatprep.subr.bf16.mxu0 %v4222_v12  ;;  %v4273_v25 = vld [vmem:[#allocation2 + $0xc4] ss:$84 sps:$4 sm:$0xff]   ;;  %v4277_v26 = vld [vmem:[#allocation2 + $0xdc] ss:$84 sps:$4 sm:$0xff]   ;;  %v4299_v29 = vld [vmem:[#allocation2 + $0x2c] ss:$84 sps:$4 sm:$0xff]  }
  0x1d   :  { %v4284_v28 = vld [vmem:[#allocation2 + $0x44] ss:$84 sps:$4 sm:$0xff]   ;;  %v4305_v31 = vld [vmem:[#allocation2 + $0xec] ss:$84 sps:$4 sm:$0xff]   ;;  %v4309_v32 = vld [vmem:[#allocation2 + $0xd4] ss:$84 sps:$4 sm:$0xff]  }
  0x1e   :  { %3489 = vmatmul.mubr.msk.bf16.vlgmr.msra.gmra.mrb[0].mxu1 %vm277_vm0, %v4213_v9  ;;  %3493 = vmatmul.mubr.msk.bf16.vlgmr.msra.gmra.mrb[0].mxu0 %vm277_vm0, %v4213_v9  ;;  %v4301_v30 = vld [vmem:[#allocation2 + $0xd8] ss:$84 sps:$4 sm:$0xff]   ;;  %v4313_v33 = vld [vmem:[#allocation2 + $0x40] ss:$84 sps:$4 sm:$0xff]   ;;  %v4330_v34 = vld [vmem:[#allocation2 + $0x3c] ss:$84 sps:$4 sm:$0xff]  }
  0x1f   :  { %326 = vmatprep.mubr.bf16.mxu1 %v4127_v0  ;;  %432 = vmatprep.mubr.bf16.mxu0 %v4127_v0  ;;  %v4332_v35 = vld [vmem:[#allocation2 + $0xe8] ss:$84 sps:$4 sm:$0xff]   ;;  %v3991_v36 = vld [vmem:[#allocation2] ss:$84 sps:$4 sm:$0xff]   ;;  %v4338_v37 = vld [vmem:[#allocation2 + $0xe4] ss:$84 sps:$4 sm:$0xff]  }
  0x20   :  { %338 = vmatpush1.bf16.msra.mxu1 %v4215_v10  ;;  %497 = vmatpush1.bf16.msra.mxu0 %v4228_v14  ;;  %v4001_v38 = vld [vmem:[#allocation2 + $0xa8] ss:$84 sps:$4 sm:$0xff]   ;;  %v4349_v39 = vld [vmem:[%s4899_s1] sm:$0xff]   ;;  %v4558_v45 = vld [vmem:[%s4899_s1 + $0x30] sm:$0xff]  }
  0x21   :  { %339 = vmatprep.subr.bf16.mxu1 %v4230_v15  ;;  %498 = vmatprep.subr.bf16.mxu0 %v4235_v16  ;;  %v4364_v40 = vld [vmem:[%s4899_s1 + $0x8] sm:$0xff]   ;;  %v4450_v41 = vld [vmem:[%s4899_s1 + $0x20] sm:$0xff]   ;;  %v4574_v46 = vld [vmem:[%s4899_s1 + $0x38] sm:$0xff]  }
  0x22   :  { %v4468_v42 = vld [vmem:[%s4899_s1 + $0x28] sm:$0xff]   ;;  %v4523_v44 = vld [vmem:[#allocation2 + $0xf0] ss:$84 sps:$4 sm:$0xff]   ;;  %v2975_v53 = vld [vmem:[%s4900_s2 + $0x18] sm:$0xff] }
  0x23   :  { %v4509_v43 = vld [vmem:[#allocation2 + $0x48] ss:$84 sps:$4 sm:$0xff]   ;;  %v2972_v47 = vld [vmem:[%s4900_s2] sm:$0xff]  ;;  %v2974_v48 = vld [vmem:[%s4900_s2 + $0x10] sm:$0xff] }
  0x24   :  { %340 = vmatpush1.bf16.msra.mxu1 %v4224_v13  ;;  %499 = vmatpush1.bf16.msra.mxu0 %v4246_v18  ;;  %v2973_v51 = vld [vmem:[%s4900_s2 + $0x8] sm:$0xff]  ;;  %v3299_v55 = vld [vmem:[%s4904_s6] sm:$0xff]  ;;  %v3301_v61 = vld [vmem:[%s4904_s6 + $0x10] sm:$0xff] }
  0x25   :  { %443 = vmatprep.subr.bf16.mxu1 %v4249_v19  ;;  %602 = vmatprep.subr.bf16.mxu0 %v4251_v20  ;;  %v3300_v56 = vld [vmem:[%s4904_s6 + $0x8] sm:$0xff]  ;;  %v3302_v62 = vld [vmem:[%s4904_s6 + $0x18] sm:$0xff]  ;;  %v3202_v63 = vld [vmem:[%s4902_s4] sm:$0xff] }
  0x26   :  { %3490 = vmatmul.mubr.msk.bf16.gmra.mrb[4].mxu1 %vm277_vm0, %v4241_v17  ;;  %3494 = vmatmul.mubr.msk.bf16.gmra.mrb[4].mxu0 %vm277_vm0, %v4241_v17 }
  0x27   :  { %369 = vmatprep.mubr.bf16.mxu1 %v4127_v0  ;;  %528 = vmatprep.mubr.bf16.mxu0 %v4127_v0 }
  0x28   :  { %2978 = vperm.xlu0 %3982, %v2972_v47   ;;  %2988 = vperm.xlu1 %3983, %v2974_v48  }
  0x2c   :  { %2983 = vperm.xlu0 %3982, %v2973_v51   ;;  %2993 = vperm.xlu1 %3983, %v2975_v53  }
  0x2e   :  { %3491 = vmatmul.mubr.msk.bf16.vlgmr.msra.gmra.mrb[8].mxu1 %vm277_vm0, %v4213_v9  ;;  %3497 = vmatmul.mubr.msk.bf16.vlgmr.msra.gmra.mrb[8].mxu0 %vm277_vm0, %v4213_v9 }
  0x2f   :  { %379 = vmatprep.mubr.bf16.mxu1 %v4127_v0  ;;  %444 = vmatpush1.bf16.msra.mxu1 %v4263_v21 }
  0x30   :  { %445 = vmatprep.subr.bf16.mxu1 %v4267_v23  ;;  %538 = vmatprep.mubr.bf16.mxu0 %v4127_v0 }
  0x31   :  { %603 = vmatpush1.bf16.msra.mxu0 %v4265_v22  ;;  %3305 = vperm.xlu0 %3982, %v3299_v55  }
  0x32   :  { %604 = vmatprep.subr.bf16.mxu0 %v4269_v24  ;;  %3310 = vperm.xlu1 %3983, %v3300_v56  }
  0x33   :  { %446 = vmatpush1.bf16.msra.mxu1 %v4273_v25 }
  0x34   :  { %549 = vmatprep.subr.bf16.mxu1 %v4279_v27 }
  0x35   :  { %605 = vmatpush1.bf16.msra.mxu0 %v4277_v26  ;;  %3315 = vperm.xlu0 %3982, %v3301_v61  }
  0x36   :  { %3492 = vmatmul.mubr.msk.bf16.gmra.mrb[12].mxu1 %vm277_vm0, %v4241_v17  ;;  %3647 = vmatprep.subr.bf16.mxu0 %v4284_v28 }
  0x37   :  { %475 = vmatprep.mubr.bf16.mxu1 %v4127_v0  ;;  %3498 = vmatmul.mubr.msk.bf16.gmra.mrb[12].mxu0 %vm277_vm0, %v4241_v17 }
  0x38   :  { %634 = vmatprep.mubr.bf16.mxu0 %v4127_v0  ;;  %3320 = vperm.xlu1 %3983, %v3302_v62  }
  0x39   :  { %3208 = vperm.xlu0 %3982, %v3202_v63  }
  0x3e   :  { %3495 = vmatmul.mubr.msk.bf16.vlgmr.msra.gmra.mrb[16].mxu1 %vm277_vm0, %v4213_v9 }
  0x3f   :  { %485 = vmatprep.mubr.bf16.mxu1 %v4127_v0  ;;  %550 = vmatpush1.bf16.msra.mxu1 %v4299_v29 }
  0x40   :  { %3501 = vmatmul.mubr.msk.bf16.vlgmr.msra.gmra.mrb[16].mxu0 %vm277_vm0, %v4213_v9  ;;  %551 = vmatprep.subr.bf16.mxu1 %v4301_v30 }
  0x41   :  { %644 = vmatprep.mubr.bf16.mxu0 %v4127_v0  ;;  %3648 = vmatpush3.bf16.msra.mxu0 %v4284_v28 }
  0x42   :  { %3649 = vmatprep.subr.bf16.mxu0 %v4305_v31 }
  0x43   :  { %552 = vmatpush1.bf16.msra.mxu1 %v4309_v32 }
  0x44   :  { %655 = vmatprep.subr.bf16.mxu1 %v4313_v33 }
  0x45   :  { %3650 = vmatpush3.bf16.msra.mxu0 %v4305_v31 }
  0x46   :  { %3496 = vmatmul.mubr.msk.bf16.gmra.mrb[20].mxu1 %vm277_vm0, %v4241_v17  ;;  %781 = vmatprep.subr.bf16.mxu0 %v4192_v3  ;;  %v3204_v3 = vld [vmem:[%s4902_s4 + $0x10] sm:$0xff] }
  0x47   :  { %581 = vmatprep.mubr.bf16.mxu1 %v4127_v0  ;;  %3218 = vperm.xlu0 %3982, %v3204_v3  }
  0x48   :  { %3502 = vmatmul.mubr.msk.bf16.gmra.mrb[20].mxu0 %vm277_vm0, %v4241_v17 }
  0x49   :  { %3651 = vmatprep.mubr.msk.bf16.mxu0 %vm277_vm0, %v4213_v9 }
  0x4e   :  { %3499 = vmatmul.mubr.msk.bf16.vlgmr.msra.gmra.mrb[24].mxu1 %vm277_vm0, %v4213_v9 }
  0x4f   :  { %591 = vmatprep.mubr.bf16.mxu1 %v4127_v0  ;;  %656 = vmatpush1.bf16.msra.mxu1 %v4330_v34 }
  0x50   :  { %3652 = vmatmul.mubr.msk.bf16.vlgmr.msra.gmra.mrb[24].mxu0 %vm277_vm0, %v4241_v17  ;;  %657 = vmatprep.subr.bf16.mxu1 %v4332_v35 }
  0x51   :  { %782 = vmatpush1.bf16.msra.mxu0 %v3991_v36  ;;  %813 = vmatprep.mubr.bf16.mxu0 %v4127_v0 }
  0x52   :  { %783 = vmatprep.subr.bf16.mxu0 %v4204_v7  ;;  %v4668_v7 = vld [vmem:[#allocation2 + $0x4c] ss:$84 sps:$4 sm:$0xff]  }
  0x53   :  { %658 = vmatpush1.bf16.msra.mxu1 %v4338_v37 }
  0x54   :  { %834 = vmatprep.subr.bf16.mxu1 %v4215_v10 }
  0x55   :  { %784 = vmatpush1.bf16.msra.mxu0 %v4001_v38 }
  0x56   :  { %3500 = vmatmul.mubr.msk.bf16.gmra.mrb[28].mxu1 %vm277_vm0, %v4241_v17  ;;  %887 = vmatprep.subr.bf16.mxu0 %v4195_v4 }
  0x57   :  { %687 = vmatprep.mubr.bf16.mxu1 %v4127_v0 }
  0x58   :  { %3511 = vmatmul.mubr.msk.bf16.vlgmr.msra.gmra.mrb[28].mxu0 %vm277_vm0, %v4349_v39 }
  0x59   :  { %823 = vmatprep.mubr.bf16.mxu0 %v4127_v0  ;;  %888 = vmatpush1.bf16.msra.mxu0 %v4218_v11 }
  0x5a   :  { %889 = vmatprep.subr.bf16.mxu0 %v4208_v8 }
  0x5d   :  { %890 = vmatpush1.bf16.msra.mxu0 %v4230_v15 }
  0x5e   :  { %3503 = vmatmul.mubr.msk.bf16.vlgmr.msra.gmra.mrb[32].mxu1 %vm277_vm0, %v4213_v9  ;;  %993 = vmatprep.subr.bf16.mxu0 %v4228_v14  ;;  %v4051_v9 = vld [vmem:[#allocation2 + $0xf4] ss:$84 sps:$4 sm:$0xff]  }
  0x5f   :  { %697 = vmatprep.mubr.bf16.mxu1 %v4127_v0  ;;  %835 = vmatpush1.bf16.msra.mxu1 %v4187_v1 }
  0x60   :  { %3512 = vmatmul.mubr.msk.bf16.gmra.mrb[32].mxu0 %vm277_vm0, %v4364_v40  ;;  %836 = vmatprep.subr.bf16.mxu1 %v4224_v13 }
  0x61   :  { %919 = vmatprep.mubr.bf16.mxu0 %v4127_v0 }
  0x63   :  { %837 = vmatpush1.bf16.msra.mxu1 %v4198_v5 }
  0x64   :  { %940 = vmatprep.subr.bf16.mxu1 %v4263_v21 }
  0x66   :  { %3504 = vmatmul.mubr.msk.bf16.gmra.mrb[36].mxu1 %vm277_vm0, %v4241_v17 }
  0x67   :  { %866 = vmatprep.mubr.bf16.mxu1 %v4127_v0 }
  0x68   :  { %3515 = vmatmul.mubr.msk.bf16.vlgmr.msra.gmra.mrb[0].mxu0 %vm277_vm0, %v4349_v39 }
  0x69   :  { %929 = vmatprep.mubr.bf16.mxu0 %v4127_v0  ;;  %994 = vmatpush1.bf16.msra.mxu0 %v4249_v19 }
  0x6a   :  { %995 = vmatprep.subr.bf16.mxu0 %v4246_v18 }
  0x6d   :  { %996 = vmatpush1.bf16.msra.mxu0 %v4267_v23 }
  0x6e   :  { %3513 = vmatmul.mubr.msk.bf16.vlgmr.msra.gmra.mrb[8].mxu1 %vm277_vm0, %v4349_v39  ;;  %1099 = vmatprep.subr.bf16.mxu0 %v4265_v22 }
  0x6f   :  { %876 = vmatprep.mubr.bf16.mxu1 %v4127_v0  ;;  %941 = vmatpush1.bf16.msra.mxu1 %v4190_v2 }
  0x70   :  { %3516 = vmatmul.mubr.msk.bf16.gmra.mrb[4].mxu0 %vm277_vm0, %v4364_v40  ;;  %942 = vmatprep.subr.bf16.mxu1 %v4273_v25 }
  0x71   :  { %1025 = vmatprep.mubr.bf16.mxu0 %v4127_v0 }
  0x73   :  { %943 = vmatpush1.bf16.msra.mxu1 %v4201_v6 }
  0x74   :  { %1046 = vmatprep.subr.bf16.mxu1 %v4299_v29 }
  0x76   :  { %3514 = vmatmul.mubr.msk.bf16.gmra.mrb[12].mxu1 %vm277_vm0, %v4364_v40 }
  0x77   :  { %972 = vmatprep.mubr.bf16.mxu1 %v4127_v0 }
  0x78   :  { %3519 = vmatmul.mubr.msk.bf16.vlgmr.msra.gmra.mrb[8].mxu0 %vm277_vm0, %v4349_v39 }
  0x79   :  { %1035 = vmatprep.mubr.bf16.mxu0 %v4127_v0  ;;  %1100 = vmatpush1.bf16.msra.mxu0 %v4279_v27 }
  0x7a   :  { %1101 = vmatprep.subr.bf16.mxu0 %v4277_v26 }
  0x7d   :  { %1102 = vmatpush1.bf16.msra.mxu0 %v4301_v30 }
  0x7e   :  { %3517 = vmatmul.mubr.msk.bf16.vlgmr.msra.gmra.mrb[16].mxu1 %vm277_vm0, %v4349_v39  ;;  %3655 = vmatprep.subr.bf16.mxu0 %v4313_v33 }
  0x7f   :  { %982 = vmatprep.mubr.bf16.mxu1 %v4127_v0  ;;  %1047 = vmatpush1.bf16.msra.mxu1 %v4222_v12 }
  0x80   :  { %3520 = vmatmul.mubr.msk.bf16.gmra.mrb[12].mxu0 %vm277_vm0, %v4364_v40  ;;  %1048 = vmatprep.subr.bf16.mxu1 %v4309_v32 }
  0x81   :  { %1131 = vmatprep.mubr.bf16.mxu0 %v4127_v0 }
  0x83   :  { %1049 = vmatpush1.bf16.msra.mxu1 %v4235_v16 }
  0x84   :  { %1152 = vmatprep.subr.bf16.mxu1 %v4330_v34 }
  0x86   :  { %3518 = vmatmul.mubr.msk.bf16.gmra.mrb[20].mxu1 %vm277_vm0, %v4364_v40 }
  0x87   :  { %1078 = vmatprep.mubr.bf16.mxu1 %v4127_v0 }
  0x88   :  { %3523 = vmatmul.mubr.msk.bf16.vlgmr.msra.gmra.mrb[16].mxu0 %vm277_vm0, %v4349_v39 }
  0x89   :  { %1141 = vmatprep.mubr.bf16.mxu0 %v4127_v0  ;;  %3656 = vmatpush3.bf16.msra.mxu0 %v4313_v33 }
  0x8a   :  { %3657 = vmatprep.subr.bf16.mxu0 %v4332_v35 }
  0x8d   :  { %3658 = vmatpush3.bf16.msra.mxu0 %v4332_v35 }
  0x8e   :  { %3521 = vmatmul.mubr.msk.bf16.vlgmr.msra.gmra.mrb[24].mxu1 %vm277_vm0, %v4349_v39  ;;  %1287 = vmatprep.subr.bf16.mxu0 %v4215_v10 }
  0x8f   :  { %1088 = vmatprep.mubr.bf16.mxu1 %v4127_v0  ;;  %1153 = vmatpush1.bf16.msra.mxu1 %v4251_v20 }
  0x90   :  { %3524 = vmatmul.mubr.msk.bf16.gmra.mrb[20].mxu0 %vm277_vm0, %v4364_v40  ;;  %1154 = vmatprep.subr.bf16.mxu1 %v4338_v37 }
  0x91   :  { %3659 = vmatprep.mubr.msk.bf16.mxu0 %vm277_vm0, %v4349_v39 }
  0x93   :  { %1155 = vmatpush1.bf16.msra.mxu1 %v4269_v24 }
  0x94   :  { %1340 = vmatprep.subr.bf16.mxu1 %v4195_v4 }
  0x96   :  { %3522 = vmatmul.mubr.msk.bf16.gmra.mrb[28].mxu1 %vm277_vm0, %v4364_v40 }
  0x97   :  { %1184 = vmatprep.mubr.bf16.mxu1 %v4127_v0 }
  0x98   :  { %3660 = vmatmul.mubr.msk.bf16.vlgmr.msra.gmra.mrb[24].mxu0 %vm277_vm0, %v4364_v40 }
  0x99   :  { %1288 = vmatpush1.bf16.msra.mxu0 %v4187_v1  ;;  %1319 = vmatprep.mubr.bf16.mxu0 %v4127_v0  ;;  %v3203_v1 = vld [vmem:[%s4902_s4 + $0x8] sm:$0xff] }
  0x9a   :  { %1289 = vmatprep.subr.bf16.mxu0 %v4224_v13  ;;  %3213 = vperm.xlu1 %3983, %v3203_v1  }
  0x9d   :  { %1290 = vmatpush1.bf16.msra.mxu0 %v4198_v5  ;;  %v3205_v5 = vld [vmem:[%s4902_s4 + $0x18] sm:$0xff] }
  0x9e   :  { %3525 = vmatmul.mubr.msk.bf16.vlgmr.msra.gmra.mrb[32].mxu1 %vm277_vm0, %v4349_v39  ;;  %1393 = vmatprep.subr.bf16.mxu0 %v4263_v21 }
  0x9f   :  { %1194 = vmatprep.mubr.bf16.mxu1 %v4127_v0  ;;  %1341 = vmatpush1.bf16.msra.mxu1 %v4218_v11 }
  0xa0   :  { %3537 = vmatmul.mubr.msk.bf16.vlgmr.msra.gmra.mrb[28].mxu0 %vm277_vm0, %v4450_v41  ;;  %1342 = vmatprep.subr.bf16.mxu1 %v4208_v8 }
  0xa1   :  { %1329 = vmatprep.mubr.bf16.mxu0 %v4127_v0  ;;  %1394 = vmatpush1.bf16.msra.mxu0 %v4190_v2 }
  0xa2   :  { %1395 = vmatprep.subr.bf16.mxu0 %v4273_v25  ;;  %3223 = vperm.xlu1 %3983, %v3205_v5  }
  0xa3   :  { %1343 = vmatpush1.bf16.msra.mxu1 %v4230_v15 }
  0xa4   :  { %1446 = vmatprep.subr.bf16.mxu1 %v4228_v14 }
  0xa5   :  { %1396 = vmatpush1.bf16.msra.mxu0 %v4201_v6 }
  0xa6   :  { %3526 = vmatmul.mubr.msk.bf16.gmra.mrb[36].mxu1 %vm277_vm0, %v4364_v40  ;;  %1499 = vmatprep.subr.bf16.mxu0 %v4299_v29 }
  0xa7   :  { %1372 = vmatprep.mubr.bf16.mxu1 %v4127_v0 }
  0xa8   :  { %3538 = vmatmul.mubr.msk.bf16.gmra.mrb[32].mxu0 %vm277_vm0, %v4468_v42 }
  0xa9   :  { %1425 = vmatprep.mubr.bf16.mxu0 %v4127_v0 }
  0xae   :  { %3539 = vmatmul.mubr.msk.bf16.vlgmr.msra.gmra.mrb[8].mxu1 %vm277_vm0, %v4450_v41 }
  0xaf   :  { %1382 = vmatprep.mubr.bf16.mxu1 %v4127_v0  ;;  %1447 = vmatpush1.bf16.msra.mxu1 %v4249_v19 }
  0xb0   :  { %3541 = vmatmul.mubr.msk.bf16.vlgmr.msra.gmra.mrb[0].mxu0 %vm277_vm0, %v4450_v41  ;;  %1448 = vmatprep.subr.bf16.mxu1 %v4246_v18 }
  0xb1   :  { %1435 = vmatprep.mubr.bf16.mxu0 %v4127_v0  ;;  %1500 = vmatpush1.bf16.msra.mxu0 %v4222_v12 }
  0xb2   :  { %1501 = vmatprep.subr.bf16.mxu0 %v4309_v32 }
  0xb3   :  { %1449 = vmatpush1.bf16.msra.mxu1 %v4267_v23 }
  0xb4   :  { %1552 = vmatprep.subr.bf16.mxu1 %v4265_v22 }
  0xb5   :  { %1502 = vmatpush1.bf16.msra.mxu0 %v4235_v16 }
  0xb6   :  { %3540 = vmatmul.mubr.msk.bf16.gmra.mrb[12].mxu1 %vm277_vm0, %v4468_v42  ;;  %1605 = vmatprep.subr.bf16.mxu0 %v4330_v34 }
  0xb7   :  { %1478 = vmatprep.mubr.bf16.mxu1 %v4127_v0 }
  0xb8   :  { %3542 = vmatmul.mubr.msk.bf16.gmra.mrb[4].mxu0 %vm277_vm0, %v4468_v42 }
  0xb9   :  { %1531 = vmatprep.mubr.bf16.mxu0 %v4127_v0 }
  0xbe   :  { %3543 = vmatmul.mubr.msk.bf16.vlgmr.msra.gmra.mrb[16].mxu1 %vm277_vm0, %v4450_v41 }
  0xbf   :  { %1488 = vmatprep.mubr.bf16.mxu1 %v4127_v0  ;;  %1553 = vmatpush1.bf16.msra.mxu1 %v4279_v27 }
  0xc0   :  { %3545 = vmatmul.mubr.msk.bf16.vlgmr.msra.gmra.mrb[8].mxu0 %vm277_vm0, %v4450_v41  ;;  %1554 = vmatprep.subr.bf16.mxu1 %v4277_v26 }
  0xc1   :  { %1541 = vmatprep.mubr.bf16.mxu0 %v4127_v0  ;;  %1606 = vmatpush1.bf16.msra.mxu0 %v4251_v20 }
  0xc2   :  { %1607 = vmatprep.subr.bf16.mxu0 %v4338_v37 }
  0xc3   :  { %1555 = vmatpush1.bf16.msra.mxu1 %v4301_v30 }
  0xc4   :  { %1658 = vmatprep.subr.bf16.mxu1 %v4284_v28 }
  0xc5   :  { %1608 = vmatpush1.bf16.msra.mxu0 %v4269_v24 }
  0xc6   :  { %3544 = vmatmul.mubr.msk.bf16.gmra.mrb[20].mxu1 %vm277_vm0, %v4468_v42  ;;  %3663 = vmatprep.subr.bf16.mxu0 %v4509_v43 }
  0xc7   :  { %1584 = vmatprep.mubr.bf16.mxu1 %v4127_v0 }
  0xc8   :  { %3546 = vmatmul.mubr.msk.bf16.gmra.mrb[12].mxu0 %vm277_vm0, %v4468_v42 }
  0xc9   :  { %1637 = vmatprep.mubr.bf16.mxu0 %v4127_v0 }
  0xce   :  { %3547 = vmatmul.mubr.msk.bf16.vlgmr.msra.gmra.mrb[24].mxu1 %vm277_vm0, %v4450_v41 }
  0xcf   :  { %1594 = vmatprep.mubr.bf16.mxu1 %v4127_v0  ;;  %1659 = vmatpush1.bf16.msra.mxu1 %v4313_v33 }
  0xd0   :  { %3549 = vmatmul.mubr.msk.bf16.vlgmr.msra.gmra.mrb[16].mxu0 %vm277_vm0, %v4450_v41  ;;  %1660 = vmatprep.subr.bf16.mxu1 %v4305_v31 }
  0xd1   :  { %1647 = vmatprep.mubr.bf16.mxu0 %v4127_v0  ;;  %3664 = vmatpush3.bf16.msra.mxu0 %v4509_v43 }
  0xd2   :  { %3665 = vmatprep.subr.bf16.mxu0 %v4523_v44 }
  0xd3   :  { %1661 = vmatpush1.bf16.msra.mxu1 %v4332_v35 }
  0xd4   :  { %1910 = vmatprep.subr.bf16.mxu1 %v4190_v2 }
  0xd5   :  { %3666 = vmatpush3.bf16.msra.mxu0 %v4523_v44 }
  0xd6   :  { %3548 = vmatmul.mubr.msk.bf16.gmra.mrb[28].mxu1 %vm277_vm0, %v4468_v42  ;;  %1857 = vmatprep.subr.bf16.mxu0 %v4218_v11 }
  0xd7   :  { %1690 = vmatprep.mubr.bf16.mxu1 %v4127_v0 }
  0xd8   :  { %3550 = vmatmul.mubr.msk.bf16.gmra.mrb[20].mxu0 %vm277_vm0, %v4468_v42 }
  0xd9   :  { %3667 = vmatprep.mubr.msk.bf16.mxu0 %vm277_vm0, %v4450_v41 }
  0xde   :  { %3551 = vmatmul.mubr.msk.bf16.vlgmr.msra.gmra.mrb[32].mxu1 %vm277_vm0, %v4450_v41 }
  0xdf   :  { %1700 = vmatprep.mubr.bf16.mxu1 %v4127_v0  ;;  %1911 = vmatpush1.bf16.msra.mxu1 %v4195_v4 }
  0xe0   :  { %3668 = vmatmul.mubr.msk.bf16.vlgmr.msra.gmra.mrb[24].mxu0 %vm277_vm0, %v4468_v42  ;;  %1912 = vmatprep.subr.bf16.mxu1 %v4201_v6 }
  0xe1   :  { %1858 = vmatpush1.bf16.msra.mxu0 %v4215_v10  ;;  %1889 = vmatprep.mubr.bf16.mxu0 %v4127_v0  ;;  %v4056_v10 = vld [vmem:[%s4901_s3] sm:$0xff]  }
  0xe2   :  { %1859 = vmatprep.subr.bf16.mxu0 %v4230_v15 }
  0xe3   :  { %1913 = vmatpush1.bf16.msra.mxu1 %v4208_v8 }
  0xe4   :  { %2016 = vmatprep.subr.bf16.mxu1 %v4222_v12 }
  0xe5   :  { %1860 = vmatpush1.bf16.msra.mxu0 %v4224_v13 }
  0xe6   :  { %3552 = vmatmul.mubr.msk.bf16.gmra.mrb[36].mxu1 %vm277_vm0, %v4468_v42  ;;  %1963 = vmatprep.subr.bf16.mxu0 %v4249_v19 }
  0xe7   :  { %1942 = vmatprep.mubr.bf16.mxu1 %v4127_v0 }
  0xe8   :  { %3563 = vmatmul.mubr.msk.bf16.vlgmr.msra.gmra.mrb[28].mxu0 %vm277_vm0, %v4558_v45 }
  0xe9   :  { %1899 = vmatprep.mubr.bf16.mxu0 %v4127_v0  ;;  %1964 = vmatpush1.bf16.msra.mxu0 %v4263_v21 }
  0xea   :  { %1965 = vmatprep.subr.bf16.mxu0 %v4267_v23 }
  0xed   :  { %1966 = vmatpush1.bf16.msra.mxu0 %v4273_v25 }
  0xee   :  { %3565 = vmatmul.mubr.msk.bf16.vlgmr.msra.gmra.mrb[8].mxu1 %vm277_vm0, %v4558_v45  ;;  %2069 = vmatprep.subr.bf16.mxu0 %v4279_v27 }
  0xef   :  { %1952 = vmatprep.mubr.bf16.mxu1 %v4127_v0  ;;  %2017 = vmatpush1.bf16.msra.mxu1 %v4228_v14 }
  0xf0   :  { %3564 = vmatmul.mubr.msk.bf16.gmra.mrb[32].mxu0 %vm277_vm0, %v4574_v46  ;;  %2018 = vmatprep.subr.bf16.mxu1 %v4235_v16 }
  0xf1   :  { %1995 = vmatprep.mubr.bf16.mxu0 %v4127_v0  ;;  %v4592_v49 = vpop.f32.mrb[0].mxu1 }
  0xf2   :  { %v4594_v50 = vpop.f32.mrb[1].mxu1 }
  0xf3   :  { %2019 = vmatpush1.bf16.msra.mxu1 %v4246_v18  ;;  %v4600_v52 = vpop.f32.mrb[2].mxu1 }
  0xf4   :  { %v4605_v54 = vpop.f32.mrb[3].mxu1  ;;  %2122 = vmatprep.subr.bf16.mxu1 %v4251_v20 }
  0xf6   :  { %3566 = vmatmul.mubr.msk.bf16.gmra.mrb[12].mxu1 %vm277_vm0, %v4574_v46 }
  0xf7   :  { %2048 = vmatprep.mubr.bf16.mxu1 %v4127_v0 }
  0xf8   :  { %3567 = vmatmul.mubr.msk.bf16.vlgmr.msra.gmra.mrb[0].mxu0 %vm277_vm0, %v4558_v45 }
  0xf9   :  { %2005 = vmatprep.mubr.bf16.mxu0 %v4127_v0  ;;  %2070 = vmatpush1.bf16.msra.mxu0 %v4299_v29  ;;  %v4621_v57 = vpop.f32.mrb[4].mxu1 }
  0xfa   :  { %2071 = vmatprep.subr.bf16.mxu0 %v4301_v30  ;;  %v4624_v58 = vpop.f32.mrb[5].mxu1 }
  0xfb   :  { %v4626_v59 = vpop.f32.mrb[6].mxu1 }
  0xfc   :  { %v4628_v60 = vpop.f32.mrb[7].mxu1 }
  0xfd   :  { %2072 = vmatpush1.bf16.msra.mxu0 %v4309_v32 }
  0xfe   :  { %3569 = vmatmul.mubr.msk.bf16.vlgmr.msra.gmra.mrb[16].mxu1 %vm277_vm0, %v4558_v45  ;;  %2175 = vmatprep.subr.bf16.mxu0 %v4313_v33 }
  0xff   :  { %2058 = vmatprep.mubr.bf16.mxu1 %v4127_v0  ;;  %2123 = vmatpush1.bf16.msra.mxu1 %v4265_v22 }
 0x100   :  { %3568 = vmatmul.mubr.msk.bf16.gmra.mrb[4].mxu0 %vm277_vm0, %v4574_v46  ;;  %2124 = vmatprep.subr.bf16.mxu1 %v4269_v24 }
 0x101   :  { %2101 = vmatprep.mubr.bf16.mxu0 %v4127_v0 }
 0x103   :  { %2125 = vmatpush1.bf16.msra.mxu1 %v4277_v26 }
 0x104   :  { %2228 = vmatprep.subr.bf16.mxu1 %v4509_v43 }
 0x106   :  { %3570 = vmatmul.mubr.msk.bf16.gmra.mrb[20].mxu1 %vm277_vm0, %v4574_v46 }
 0x107   :  { %2154 = vmatprep.mubr.bf16.mxu1 %v4127_v0 }
 0x108   :  { %3571 = vmatmul.mubr.msk.bf16.vlgmr.msra.gmra.mrb[8].mxu0 %vm277_vm0, %v4558_v45 }
 0x109   :  { %2111 = vmatprep.mubr.bf16.mxu0 %v4127_v0  ;;  %2176 = vmatpush1.bf16.msra.mxu0 %v4330_v34 }
 0x10a   :  { %2177 = vmatprep.subr.bf16.mxu0 %v4332_v35 }
 0x10d   :  { %2178 = vmatpush1.bf16.msra.mxu0 %v4338_v37 }
 0x10e   :  { %3573 = vmatmul.mubr.msk.bf16.vlgmr.msra.gmra.mrb[24].mxu1 %vm277_vm0, %v4558_v45  ;;  %3671 = vmatprep.subr.bf16.mxu0 %v4668_v7 }
 0x10f   :  { %2164 = vmatprep.mubr.bf16.mxu1 %v4127_v0  ;;  %2229 = vmatpush1.bf16.msra.mxu1 %v4284_v28 }
 0x110   :  { %3572 = vmatmul.mubr.msk.bf16.gmra.mrb[12].mxu0 %vm277_vm0, %v4574_v46  ;;  %2230 = vmatprep.subr.bf16.mxu1 %v4523_v44 }
 0x111   :  { %2207 = vmatprep.mubr.bf16.mxu0 %v4127_v0 }
 0x113   :  { %2231 = vmatpush1.bf16.msra.mxu1 %v4305_v31 }
 0x114   :  { %2484 = vmatprep.subr.bf16.mxu1 %v4263_v21 }
 0x116   :  { %3574 = vmatmul.mubr.msk.bf16.gmra.mrb[28].mxu1 %vm277_vm0, %v4574_v46 }
 0x117   :  { %2260 = vmatprep.mubr.bf16.mxu1 %v4127_v0 }
 0x118   :  { %3575 = vmatmul.mubr.msk.bf16.vlgmr.msra.gmra.mrb[16].mxu0 %vm277_vm0, %v4558_v45 }
 0x119   :  { %2217 = vmatprep.mubr.bf16.mxu0 %v4127_v0  ;;  %3672 = vmatpush3.bf16.msra.mxu0 %v4668_v7 }
 0x11a   :  { %3673 = vmatprep.subr.bf16.mxu0 %v4051_v9 }
 0x11d   :  { %3674 = vmatpush3.bf16.msra.mxu0 %v4051_v9 }
 0x11e   :  { %3577 = vmatmul.mubr.msk.bf16.vlgmr.msra.gmra.mrb[32].mxu1 %vm277_vm0, %v4558_v45  ;;  %2431 = vmatprep.subr.bf16.mxu0 %v4195_v4  ;;  %v4053_v4 = vld [vmem:[%s4899_s1 + $0x48] sm:$0xff]  }
 0x11f   :  { %2270 = vmatprep.mubr.bf16.mxu1 %v4127_v0  ;;  %2485 = vmatpush1.bf16.msra.mxu1 %v4190_v2  ;;  %v4052_v2 = vld [vmem:[%s4899_s1 + $0x40] sm:$0xff]  }
 0x120   :  { %3576 = vmatmul.mubr.msk.bf16.gmra.mrb[20].mxu0 %vm277_vm0, %v4574_v46  ;;  %2486 = vmatprep.subr.bf16.mxu1 %v4273_v25 }
 0x121   :  { %3675 = vmatprep.mubr.msk.bf16.mxu0 %vm277_vm0, %v4558_v45 }
 0x123   :  { %2487 = vmatpush1.bf16.msra.mxu1 %v4201_v6  ;;  %v4054_v6 = vld [vmem:[#allocation2 + $0x50] ss:$84 sps:$4 sm:$0xff]  }
 0x124   :  { %2590 = vmatprep.subr.bf16.mxu1 %v4299_v29 }
 0x126   :  { %3578 = vmatmul.mubr.msk.bf16.gmra.mrb[36].mxu1 %vm277_vm0, %v4574_v46 }
 0x127   :  { %2516 = vmatprep.mubr.bf16.mxu1 %v4127_v0 }
 0x128   :  { %3676 = vmatmul.mubr.msk.bf16.vlgmr.msra.gmra.mrb[24].mxu0 %vm277_vm0, %v4574_v46 }
 0x129   :  { %2432 = vmatpush1.bf16.msra.mxu0 %v4218_v11  ;;  %2463 = vmatprep.mubr.bf16.mxu0 %v4127_v0  ;;  %v4774_v11 = vpop.permute.xlu0 %2978 }
 0x12a   :  { %2433 = vmatprep.subr.bf16.mxu0 %v4208_v8  ;;  %v4055_v8 = vld [vmem:[#allocation2 + $0xf8] ss:$84 sps:$4 sm:$0xff]  }
 0x12d   :  { %2434 = vmatpush1.bf16.msra.mxu0 %v4230_v15  ;;  %v4779_v21 = vpop.permute.xlu0 %2983 }
 0x12e   :  { %3591 = vmatmul.mubr.msk.bf16.vlgmr.msra.gmra.mrb[8].mxu1 %vm277_vm0, %v4052_v2  ;;  %2537 = vmatprep.subr.bf16.mxu0 %v4228_v14 }
 0x12f   :  { %2526 = vmatprep.mubr.bf16.mxu1 %v4127_v0  ;;  %2591 = vmatpush1.bf16.msra.mxu1 %v4222_v12 }
 0x130   :  { %3589 = vmatmul.mubr.msk.bf16.vlgmr.msra.gmra.mrb[28].mxu0 %vm277_vm0, %v4052_v2  ;;  %2592 = vmatprep.subr.bf16.mxu1 %v4309_v32 }
 0x131   :  { %2473 = vmatprep.mubr.bf16.mxu0 %v4127_v0  ;;  %2538 = vmatpush1.bf16.msra.mxu0 %v4249_v19 }
 0x132   :  { %2539 = vmatprep.subr.bf16.mxu0 %v4246_v18 }
 0x133   :  { %2593 = vmatpush1.bf16.msra.mxu1 %v4235_v16 }
 0x134   :  { %2696 = vmatprep.subr.bf16.mxu1 %v4330_v34 }
 0x135   :  { %2540 = vmatpush1.bf16.msra.mxu0 %v4267_v23 }
 0x136   :  { %3592 = vmatmul.mubr.msk.bf16.gmra.mrb[12].mxu1 %vm277_vm0, %v4053_v4  ;;  %2643 = vmatprep.subr.bf16.mxu0 %v4265_v22 }
 0x137   :  { %2622 = vmatprep.mubr.bf16.mxu1 %v4127_v0 }
 0x138   :  { %3590 = vmatmul.mubr.msk.bf16.gmra.mrb[32].mxu0 %vm277_vm0, %v4053_v4 }
 0x139   :  { %2569 = vmatprep.mubr.bf16.mxu0 %v4127_v0 }
 0x13e   :  { %3595 = vmatmul.mubr.msk.bf16.vlgmr.msra.gmra.mrb[16].mxu1 %vm277_vm0, %v4052_v2 }
 0x13f   :  { %2632 = vmatprep.mubr.bf16.mxu1 %v4127_v0  ;;  %2697 = vmatpush1.bf16.msra.mxu1 %v4251_v20 }
 0x140   :  { %3593 = vmatmul.mubr.msk.bf16.vlgmr.msra.gmra.mrb[0].mxu0 %vm277_vm0, %v4052_v2  ;;  %2698 = vmatprep.subr.bf16.mxu1 %v4338_v37 }
 0x141   :  { %2579 = vmatprep.mubr.bf16.mxu0 %v4127_v0  ;;  %2644 = vmatpush1.bf16.msra.mxu0 %v4279_v27  ;;  %v4785_v27 = vpop.permute.xlu1 %2988 }
 0x142   :  { %2645 = vmatprep.subr.bf16.mxu0 %v4277_v26 }
 0x143   :  { %2699 = vmatpush1.bf16.msra.mxu1 %v4269_v24 }
 0x144   :  { %2802 = vmatprep.subr.bf16.mxu1 %v4668_v7 }
 0x145   :  { %2646 = vmatpush1.bf16.msra.mxu0 %v4301_v30  ;;  %v4794_v51 = vpop.permute.xlu1 %2993 }
 0x146   :  { %3596 = vmatmul.mubr.msk.bf16.gmra.mrb[20].mxu1 %vm277_vm0, %v4053_v4  ;;  %2749 = vmatprep.subr.bf16.mxu0 %v4284_v28 }
 0x147   :  { %2728 = vmatprep.mubr.bf16.mxu1 %v4127_v0 }
 0x148   :  { %3594 = vmatmul.mubr.msk.bf16.gmra.mrb[4].mxu0 %vm277_vm0, %v4053_v4 }
 0x149   :  { %2675 = vmatprep.mubr.bf16.mxu0 %v4127_v0 }
 0x14e   :  { %3599 = vmatmul.mubr.msk.bf16.vlgmr.msra.gmra.mrb[24].mxu1 %vm277_vm0, %v4052_v2 }
 0x14f   :  { %2738 = vmatprep.mubr.bf16.mxu1 %v4127_v0  ;;  %2803 = vmatpush1.bf16.msra.mxu1 %v4509_v43 }
 0x150   :  { %3597 = vmatmul.mubr.msk.bf16.vlgmr.msra.gmra.mrb[8].mxu0 %vm277_vm0, %v4052_v2  ;;  %2804 = vmatprep.subr.bf16.mxu1 %v4051_v9 }
 0x151   :  { %2685 = vmatprep.mubr.bf16.mxu0 %v4127_v0  ;;  %2750 = vmatpush1.bf16.msra.mxu0 %v4313_v33 }
 0x152   :  { %2751 = vmatprep.subr.bf16.mxu0 %v4305_v31 }
 0x153   :  { %2805 = vmatpush1.bf16.msra.mxu1 %v4523_v44 }
 0x155   :  { %2752 = vmatpush1.bf16.msra.mxu0 %v4332_v35 }
 0x156   :  { %3600 = vmatmul.mubr.msk.bf16.gmra.mrb[28].mxu1 %vm277_vm0, %v4053_v4  ;;  %3679 = vmatprep.subr.bf16.mxu0 %v4054_v6 }
 0x157   :  { %2834 = vmatprep.mubr.bf16.mxu1 %v4127_v0 }
 0x158   :  { %3598 = vmatmul.mubr.msk.bf16.gmra.mrb[12].mxu0 %vm277_vm0, %v4053_v4 }
 0x159   :  { %2781 = vmatprep.mubr.bf16.mxu0 %v4127_v0 }
 0x15e   :  { %3603 = vmatmul.mubr.msk.bf16.vlgmr.msra.gmra.mrb[32].mxu1 %vm277_vm0, %v4052_v2 }
 0x15f   :  { %2844 = vmatprep.mubr.bf16.mxu1 %v4127_v0 }
 0x160   :  { %3601 = vmatmul.mubr.msk.bf16.vlgmr.msra.gmra.mrb[16].mxu0 %vm277_vm0, %v4052_v2 }
 0x161   :  { %2791 = vmatprep.mubr.bf16.mxu0 %v4127_v0  ;;  %3680 = vmatpush3.bf16.msra.mxu0 %v4054_v6 }
 0x162   :  { %3681 = vmatprep.subr.bf16.mxu0 %v4055_v8 }
 0x165   :  { %3682 = vmatpush3.bf16.msra.mxu0 %v4055_v8 }
 0x166   :  { %3604 = vmatmul.mubr.msk.bf16.gmra.mrb[36].mxu1 %vm277_vm0, %v4053_v4 }
 0x167   :  { %3691 = vmatprep.mubr.msk.bf16.mxu1 %vm277_vm0, %v4056_v10 }
 0x168   :  { %3602 = vmatmul.mubr.msk.bf16.gmra.mrb[20].mxu0 %vm277_vm0, %v4053_v4 }
 0x169   :  { %3683 = vmatprep.mubr.msk.bf16.mxu0 %vm277_vm0, %v4052_v2 }
 0x170   :  { %3684 = vmatmul.mubr.msk.bf16.vlgmr.msra.gmra.mrb[24].mxu0 %vm277_vm0, %v4053_v4 }
 0x201   :  { %v2518_v0 = vpop.f32.mrb[8].mxu1 }
 0x202   :  { %v2520_v12 = vpop.f32.mrb[9].mxu1  ;;  %v2998_v24 = vadd.f32 %v4774_v11, %v2518_v0 }
 0x203   :  { %v2465_v13 = vpop.f32.mrb[28].mxu0  ;;  %v2522_v14 = vpop.f32.mrb[10].mxu1  ;;  %v2999_v29 = vadd.f32 %v4774_v11, %v2520_v12 }
 0x204   :  { %v3703_v15 = vadd.f32 %v2465_v13, %v4592_v49  ;;  %v2467_v16 = vpop.f32.mrb[29].mxu0  ;;  %v2524_v17 = vpop.f32.mrb[11].mxu1  ;;  %v3015_v32 = vadd.f32 %v4779_v21, %v2522_v14  ;;  %v3066_v38 = vmax.f32 %v2998_v24, 0.0 }
 0x205   :  { %v3704_v18 = vadd.f32 %v2467_v16, %v4594_v50  ;;  %v2469_v19 = vpop.f32.mrb[30].mxu0  ;;  %v3016_v36 = vadd.f32 %v4779_v21, %v2524_v17  ;;  %v3067_v43 = vmax.f32 %v2999_v29, 0.0 }
 0x206   :  { %v2996_v20 = vadd.f32 %v3703_v15, %v4774_v11  ;;  %v3705_v22 = vadd.f32 %v2469_v19, %v4600_v52  ;;  %v2471_v23 = vpop.f32.mrb[31].mxu0  ;;  %v3083_v48 = vmax.f32 %v3015_v32, 0.0 }
 0x207   :  { %v2997_v25 = vadd.f32 %v3704_v18, %v4774_v11  ;;  %v3706_v26 = vadd.f32 %v2471_v23, %v4605_v54  ;;  %v3084_v53 = vmax.f32 %v3016_v36, 0.0 }
 0x208   :  { %v3064_v28 = vmax.f32 %v2996_v20, 0.0  ;;  %v3013_v30 = vadd.f32 %v3705_v22, %v4779_v21 }
 0x209   :  { %v3065_v31 = vmax.f32 %v2997_v25, 0.0  ;;  %v3014_v33 = vadd.f32 %v3706_v26, %v4779_v21  ;;  %v2528_v34 = vpop.f32.mrb[12].mxu1 }
 0x20a   :  { %v3081_v35 = vmax.f32 %v3013_v30, 0.0  ;;  %v2530_v37 = vpop.f32.mrb[13].mxu1  ;;  %v3032_v55 = vadd.f32 %v4785_v27, %v2528_v34 }
 0x20b   :  { %v3132_v39 = vmax.f32 %v3064_v28, %v3065_v31  ;;  %v3082_v40 = vmax.f32 %v3014_v33, 0.0  ;;  %v2475_v41 = vpop.f32.mrb[32].mxu0  ;;  %v2532_v42 = vpop.f32.mrb[14].mxu1 }
 0x20c   :  { %v3707_v44 = vadd.f32 %v2475_v41, %v4621_v57  ;;  %v2477_v45 = vpop.f32.mrb[33].mxu0  ;;  %v2534_v46 = vpop.f32.mrb[15].mxu1  ;;  %v3049_v7 = vadd.f32 %v4794_v51, %v2532_v42  ;;  %v3100_v0 = vmax.f32 %v3032_v55, 0.0 }
 0x20d   :  { %v3136_v47 = vmax.f32 %v3132_v39, %v3066_v38  ;;  %v3133_v49 = vmax.f32 %v3081_v35, %v3082_v40  ;;  %v3708_v50 = vadd.f32 %v2477_v45, %v4624_v58  ;;  %v2479_v52 = vpop.f32.mrb[34].mxu0  ;;  %v3033_v58 = vadd.f32 %v4785_v27, %v2530_v37 }
 0x20e   :  { %v3030_v54 = vadd.f32 %v3707_v44, %v4785_v27  ;;  %v3709_v56 = vadd.f32 %v2479_v52, %v4626_v59  ;;  %v2481_v61 = vpop.f32.mrb[35].mxu0  ;;  %v3050_v59 = vadd.f32 %v4794_v51, %v2534_v46  ;;  %v3117_v16 = vmax.f32 %v3049_v7, 0.0 }
 0x20f   :  { %v3140_v62 = vmax.f32 %v3136_v47, %v3067_v43  ;;  %v3137_v57 = vmax.f32 %v3133_v49, %v3083_v48  ;;  %v3031_v63 = vadd.f32 %v3708_v50, %v4785_v27  ;;  %v3710_v1 = vadd.f32 %v2481_v61, %v4628_v60 }
 0x210   :  { %v3098_v3 = vmax.f32 %v3030_v54, 0.0  ;;  %v3047_v5 = vadd.f32 %v3709_v56, %v4794_v51  ;;  %v3101_v15 = vmax.f32 %v3033_v58, 0.0  ;;  %v3118_v23 = vmax.f32 %v3050_v59, 0.0 }
 0x211   :  { %v3141_v9 = vmax.f32 %v3137_v57, %v3084_v53  ;;  %v3099_v2 = vmax.f32 %v3031_v63, 0.0  ;;  %v3048_v4 = vadd.f32 %v3710_v1, %v4794_v51  ;;  %v2624_v6 = vpop.f32.mrb[16].mxu1 }
 0x212   :  { %v3115_v8 = vmax.f32 %v3047_v5, 0.0  ;;  %v2626_v10 = vpop.f32.mrb[17].mxu1  ;;  %v3002_v28 = vadd.f32 %v4774_v11, %v2624_v6 }
 0x213   :  { %v3134_v12 = vmax.f32 %v3098_v3, %v3099_v2  ;;  %v3116_v13 = vmax.f32 %v3048_v4, 0.0  ;;  %v2571_v60 = vpop.f32.mrb[0].mxu0  ;;  %v2628_v14 = vpop.f32.mrb[18].mxu1  ;;  %v3003_v29 = vadd.f32 %v4774_v11, %v2626_v10 }
 0x214   :  { %v3000_v17 = vadd.f32 %v4774_v11, %v2571_v60  ;;  %v2573_v18 = vpop.f32.mrb[1].mxu0  ;;  %v2630_v19 = vpop.f32.mrb[19].mxu1  ;;  %v3019_v38 = vadd.f32 %v4779_v21, %v2628_v14  ;;  %v3070_v43 = vmax.f32 %v3002_v28, 0.0 }
 0x215   :  { %v3138_v20 = vmax.f32 %v3134_v12, %v3100_v0  ;;  %v3135_v22 = vmax.f32 %v3115_v8, %v3116_v13  ;;  %v3001_v24 = vadd.f32 %v4774_v11, %v2573_v18  ;;  %v2575_v25 = vpop.f32.mrb[2].mxu0  ;;  %v3020_v41 = vadd.f32 %v4779_v21, %v2630_v19 }
 0x216   :  { %v3068_v26 = vmax.f32 %v3000_v17, 0.0  ;;  %v3017_v30 = vadd.f32 %v4779_v21, %v2575_v25  ;;  %v2577_v31 = vpop.f32.mrb[3].mxu0  ;;  %v3071_v47 = vmax.f32 %v3003_v29, 0.0  ;;  %v3087_v52 = vmax.f32 %v3019_v38, 0.0 }
 0x217   :  { %v3142_v32 = vmax.f32 %v3138_v20, %v3101_v15  ;;  %v3139_v33 = vmax.f32 %v3135_v22, %v3117_v16  ;;  %v3069_v34 = vmax.f32 %v3001_v24, 0.0  ;;  %v3018_v35 = vadd.f32 %v4779_v21, %v2577_v31 }
 0x218   :  { %v3144_v36 = vmax.f32 %v3140_v62, %v3068_v26  ;;  %v3085_v37 = vmax.f32 %v3017_v30, 0.0  ;;  %v3088_v61 = vmax.f32 %v3020_v41, 0.0 }
 0x219   :  { %v3143_v39 = vmax.f32 %v3139_v33, %v3118_v23  ;;  %v3086_v40 = vmax.f32 %v3018_v35, 0.0  ;;  %v2634_v42 = vpop.f32.mrb[20].mxu1 }
 0x21a   :  { %v3148_v44 = vmax.f32 %v3144_v36, %v3069_v34  ;;  %v3145_v45 = vmax.f32 %v3141_v9, %v3085_v37  ;;  %v2636_v46 = vpop.f32.mrb[21].mxu1  ;;  %v3036_v62 = vadd.f32 %v4785_v27, %v2634_v42 }
 0x21b   :  { %v2581_v48 = vpop.f32.mrb[4].mxu0  ;;  %v2638_v49 = vpop.f32.mrb[22].mxu1  ;;  %v3037_v2 = vadd.f32 %v4785_v27, %v2636_v46 }
 0x21c   :  { %v3152_v50 = vmax.f32 %v3148_v44, %v3070_v43  ;;  %v3149_v53 = vmax.f32 %v3145_v45, %v3086_v40  ;;  %v3034_v54 = vadd.f32 %v4785_v27, %v2581_v48  ;;  %v2583_v55 = vpop.f32.mrb[5].mxu0  ;;  %v2640_v56 = vpop.f32.mrb[23].mxu1  ;;  %v3053_v10 = vadd.f32 %v4794_v51, %v2638_v49 }
 0x21d   :  { %v3035_v57 = vadd.f32 %v4785_v27, %v2583_v55  ;;  %v2585_v63 = vpop.f32.mrb[6].mxu0  ;;  %v3054_v12 = vadd.f32 %v4794_v51, %v2640_v56  ;;  %v3104_v60 = vmax.f32 %v3036_v62, 0.0  ;;  %v3105_v17 = vmax.f32 %v3037_v2, 0.0 }
 0x21e   :  { %v3156_v1 = vmax.f32 %v3152_v50, %v3071_v47  ;;  %v3153_v3 = vmax.f32 %v3149_v53, %v3087_v52  ;;  %v3102_v58 = vmax.f32 %v3034_v54, 0.0  ;;  %v3051_v5 = vadd.f32 %v4794_v51, %v2585_v63  ;;  %v2587_v7 = vpop.f32.mrb[7].mxu0 }
 0x21f   :  { %v3103_v9 = vmax.f32 %v3035_v57, 0.0  ;;  %v3052_v4 = vadd.f32 %v4794_v51, %v2587_v7  ;;  %v3121_v22 = vmax.f32 %v3053_v10, 0.0  ;;  %v3122_v28 = vmax.f32 %v3054_v12, 0.0 }
 0x220   :  { %v3157_v59 = vmax.f32 %v3153_v3, %v3088_v61  ;;  %v3146_v6 = vmax.f32 %v3142_v32, %v3102_v58  ;;  %v3119_v8 = vmax.f32 %v3051_v5, 0.0 }
 0x221   :  { %v3120_v0 = vmax.f32 %v3052_v4, 0.0  ;;  %v2730_v13 = vpop.f32.mrb[24].mxu1 }
 0x222   :  { %v3150_v14 = vmax.f32 %v3146_v6, %v3103_v9  ;;  %v3147_v15 = vmax.f32 %v3143_v39, %v3119_v8  ;;  %v2732_v16 = vpop.f32.mrb[25].mxu1  ;;  %v3006_v29 = vadd.f32 %v4774_v11, %v2730_v13 }
 0x223   :  { %v2677_v18 = vpop.f32.mrb[8].mxu0  ;;  %v2734_v19 = vpop.f32.mrb[26].mxu1  ;;  %v3007_v38 = vadd.f32 %v4774_v11, %v2732_v16 }
 0x224   :  { %v3154_v20 = vmax.f32 %v3150_v14, %v3104_v60  ;;  %v3151_v23 = vmax.f32 %v3147_v15, %v3120_v0  ;;  %v3004_v24 = vadd.f32 %v4774_v11, %v2677_v18  ;;  %v2679_v25 = vpop.f32.mrb[9].mxu0  ;;  %v2736_v26 = vpop.f32.mrb[27].mxu1  ;;  %v3023_v43 = vadd.f32 %v4779_v21, %v2734_v19 }
 0x225   :  { %v3005_v30 = vadd.f32 %v4774_v11, %v2679_v25  ;;  %v2681_v31 = vpop.f32.mrb[10].mxu0  ;;  %v3024_v45 = vadd.f32 %v4779_v21, %v2736_v26  ;;  %v3074_v47 = vmax.f32 %v3006_v29, 0.0  ;;  %v3075_v52 = vmax.f32 %v3007_v38, 0.0 }
 0x226   :  { %v3158_v32 = vmax.f32 %v3154_v20, %v3105_v17  ;;  %v3155_v33 = vmax.f32 %v3151_v23, %v3121_v22  ;;  %v3072_v34 = vmax.f32 %v3004_v24, 0.0  ;;  %v3021_v35 = vadd.f32 %v4779_v21, %v2681_v31  ;;  %v2683_v36 = vpop.f32.mrb[11].mxu0 }
 0x227   :  { %v3073_v37 = vmax.f32 %v3005_v30, 0.0  ;;  %v3022_v39 = vadd.f32 %v4779_v21, %v2683_v36  ;;  %v3091_v56 = vmax.f32 %v3023_v43, 0.0 }
 0x228   :  { %v3159_v40 = vmax.f32 %v3155_v33, %v3122_v28  ;;  %v3160_v41 = vmax.f32 %v3156_v1, %v3072_v34  ;;  %v3089_v42 = vmax.f32 %v3021_v35, 0.0  ;;  %v3092_v1 = vmax.f32 %v3024_v45, 0.0 }
 0x229   :  { %v3090_v44 = vmax.f32 %v3022_v39, 0.0  ;;  %v2740_v46 = vpop.f32.mrb[28].mxu1 }
 0x22a   :  { %v3164_v48 = vmax.f32 %v3160_v41, %v3073_v37  ;;  %v3161_v49 = vmax.f32 %v3157_v59, %v3089_v42  ;;  %v2742_v50 = vpop.f32.mrb[29].mxu1  ;;  %v3040_v3 = vadd.f32 %v4785_v27, %v2740_v46 }
 0x22b   :  { %v2687_v53 = vpop.f32.mrb[12].mxu0  ;;  %v2744_v54 = vpop.f32.mrb[30].mxu1  ;;  %v3041_v8 = vadd.f32 %v4785_v27, %v2742_v50 }
 0x22c   :  { %v3168_v55 = vmax.f32 %v3164_v48, %v3074_v47  ;;  %v3165_v61 = vmax.f32 %v3161_v49, %v3090_v44  ;;  %v3038_v62 = vadd.f32 %v4785_v27, %v2687_v53  ;;  %v2689_v57 = vpop.f32.mrb[13].mxu0  ;;  %v2746_v63 = vpop.f32.mrb[31].mxu1  ;;  %v3057_v60 = vadd.f32 %v4794_v51, %v2744_v54 }
 0x22d   :  { %v3039_v58 = vadd.f32 %v4785_v27, %v2689_v57  ;;  %v2691_v5 = vpop.f32.mrb[14].mxu0  ;;  %v3058_v15 = vadd.f32 %v4794_v51, %v2746_v63  ;;  %v3108_v17 = vmax.f32 %v3040_v3, 0.0  ;;  %v3109_v22 = vmax.f32 %v3041_v8, 0.0 }
 0x22e   :  { %v3172_v7 = vmax.f32 %v3168_v55, %v3075_v52  ;;  %v3169_v9 = vmax.f32 %v3165_v61, %v3091_v56  ;;  %v3106_v2 = vmax.f32 %v3038_v62, 0.0  ;;  %v3055_v4 = vadd.f32 %v4794_v51, %v2691_v5  ;;  %v2693_v59 = vpop.f32.mrb[15].mxu0 }
 0x22f   :  { %v3107_v6 = vmax.f32 %v3039_v58, 0.0  ;;  %v3056_v10 = vadd.f32 %v4794_v51, %v2693_v59  ;;  %v3125_v26 = vmax.f32 %v3057_v60, 0.0 }
 0x230   :  { %v3173_v0 = vmax.f32 %v3169_v9, %v3092_v1  ;;  %v3162_v12 = vmax.f32 %v3158_v32, %v3106_v2  ;;  %v3123_v13 = vmax.f32 %v3055_v4, 0.0  ;;  %v3126_v32 = vmax.f32 %v3058_v15, 0.0 }
 0x231   :  { %v3124_v14 = vmax.f32 %v3056_v10, 0.0  ;;  %v2836_v16 = vpop.f32.mrb[32].mxu1 }
 0x232   :  { %v3166_v18 = vmax.f32 %v3162_v12, %v3107_v6  ;;  %v3163_v19 = vmax.f32 %v3159_v40, %v3123_v13  ;;  %v2838_v20 = vpop.f32.mrb[33].mxu1  ;;  %v3010_v33 = vadd.f32 %v4774_v11, %v2836_v16 }
 0x233   :  { %v2783_v23 = vpop.f32.mrb[16].mxu0  ;;  %v2840_v24 = vpop.f32.mrb[34].mxu1  ;;  %v3011_v42 = vadd.f32 %v4774_v11, %v2838_v20 }
 0x234   :  { %v3170_v25 = vmax.f32 %v3166_v18, %v3108_v17  ;;  %v3167_v28 = vmax.f32 %v3163_v19, %v3124_v14  ;;  %v3008_v29 = vadd.f32 %v4774_v11, %v2783_v23  ;;  %v2785_v30 = vpop.f32.mrb[17].mxu0  ;;  %v2842_v31 = vpop.f32.mrb[35].mxu1  ;;  %v3027_v47 = vadd.f32 %v4779_v21, %v2840_v24 }
 0x235   :  { %v3009_v34 = vadd.f32 %v4774_v11, %v2785_v30  ;;  %v2787_v35 = vpop.f32.mrb[18].mxu0  ;;  %v3028_v49 = vadd.f32 %v4779_v21, %v2842_v31  ;;  %v3078_v52 = vmax.f32 %v3010_v33, 0.0  ;;  %v3079_v56 = vmax.f32 %v3011_v42, 0.0 }
 0x236   :  { %v3174_v36 = vmax.f32 %v3170_v25, %v3109_v22  ;;  %v3171_v37 = vmax.f32 %v3167_v28, %v3125_v26  ;;  %v3076_v38 = vmax.f32 %v3008_v29, 0.0  ;;  %v3025_v39 = vadd.f32 %v4779_v21, %v2787_v35  ;;  %v2789_v40 = vpop.f32.mrb[19].mxu0 }
 0x237   :  { %v3077_v41 = vmax.f32 %v3009_v34, 0.0  ;;  %v3026_v43 = vadd.f32 %v4779_v21, %v2789_v40  ;;  %v3095_v63 = vmax.f32 %v3027_v47, 0.0 }
 0x238   :  { %v3175_v44 = vmax.f32 %v3171_v37, %v3126_v32  ;;  %v3176_v45 = vmax.f32 %v3172_v7, %v3076_v38  ;;  %v3093_v46 = vmax.f32 %v3025_v39, 0.0  ;;  %v3096_v7 = vmax.f32 %v3028_v49, 0.0  ;;  %v4059_v49 = vld [vmem:[%s4903_s5 + $0x8] sm:$0xff]  }
 0x239   :  { %v3094_v48 = vmax.f32 %v3026_v43, 0.0  ;;  %v2846_v50 = vpop.f32.mrb[36].mxu1 }
 0x23a   :  { %v3180_v53 = vmax.f32 %v3176_v45, %v3077_v41  ;;  %v3177_v54 = vmax.f32 %v3173_v0, %v3093_v46  ;;  %v2848_v55 = vpop.f32.mrb[37].mxu1  ;;  %v3044_v9 = vadd.f32 %v4785_v27, %v2846_v50 }
 0x23b   :  { %v2793_v61 = vpop.f32.mrb[20].mxu0  ;;  %v2850_v62 = vpop.f32.mrb[38].mxu1  ;;  %v3045_v13 = vadd.f32 %v4785_v27, %v2848_v55 }
 0x23c   :  { %v3184_v57 = vmax.f32 %v3180_v53, %v3078_v52  ;;  %v3181_v1 = vmax.f32 %v3177_v54, %v3094_v48  ;;  %v3042_v3 = vadd.f32 %v4785_v27, %v2793_v61  ;;  %v2795_v58 = vpop.f32.mrb[21].mxu0  ;;  %v2852_v5 = vpop.f32.mrb[39].mxu1  ;;  %v3061_v17 = vadd.f32 %v4794_v51, %v2850_v62  ;;  %v4058_v48 = vld [vmem:[%s4903_s5] sm:$0xff]  }
 0x23d   :  { %v3043_v2 = vadd.f32 %v4785_v27, %v2795_v58  ;;  %v2797_v4 = vpop.f32.mrb[22].mxu0  ;;  %v3062_v19 = vadd.f32 %v4794_v51, %v2852_v5  ;;  %v3112_v20 = vmax.f32 %v3044_v9, 0.0  ;;  %v3113_v24 = vmax.f32 %v3045_v13, 0.0  ;;  %v3306_v53 = vpop.permute.xlu0 %3305 }
 0x23e   :  { %v3188_v59 = vmax.f32 %v3184_v57, %v3079_v56  ;;  %v3185_v6 = vmax.f32 %v3181_v1, %v3095_v63  ;;  %v3110_v8 = vmax.f32 %v3042_v3, 0.0  ;;  %v3059_v10 = vadd.f32 %v4794_v51, %v2797_v4  ;;  %v2799_v0 = vpop.f32.mrb[23].mxu0  ;;  %v3311_v56 = vpop.permute.xlu1 %3310 }
 0x23f   :  { %v3111_v12 = vmax.f32 %v3043_v2, 0.0  ;;  %v3060_v60 = vadd.f32 %v4794_v51, %v2799_v0  ;;  %v3129_v28 = vmax.f32 %v3061_v17, 0.0  ;;  %v3130_v32 = vmax.f32 %v3062_v19, 0.0 }
 0x240   :  { %v3189_v14 = vmax.f32 %v3185_v6, %v3096_v7  ;;  %v3178_v15 = vmax.f32 %v3174_v36, %v3110_v8  ;;  %v3127_v16 = vmax.f32 %v3059_v10, 0.0 }
 0x241   :  { %v3128_v18 = vmax.f32 %v3060_v60, 0.0  ;;  %v3316_v61 = vpop.permute.xlu0 %3315 }
 0x242   :  { %v3182_v22 = vmax.f32 %v3178_v15, %v3111_v12  ;;  %v3179_v23 = vmax.f32 %v3175_v44, %v3127_v16  ;;  %v3321_v1 = vpop.permute.xlu1 %3320 }
 0x243   :  { %v3685_v25 = vpop.f32.mrb[24].mxu0 }
 0x244   :  { %v3186_v26 = vmax.f32 %v3182_v22, %v3112_v20  ;;  %v3183_v29 = vmax.f32 %v3179_v23, %v3128_v18  ;;  %v3046_v30 = vadd.f32 %v3685_v25, %v4785_v27  ;;  %v2889_v31 = vpop.f32.mrb[25].mxu0 }
 0x245   :  { %v3012_v33 = vadd.f32 %v4774_v11, %v2889_v31  ;;  %v3686_v34 = vpop.f32.mrb[26].mxu0  ;;  %v3209_v0 = vpop.permute.xlu0 %3208 }
 0x246   :  { %v3190_v35 = vmax.f32 %v3186_v26, %v3113_v24  ;;  %v3187_v36 = vmax.f32 %v3183_v29, %v3129_v28  ;;  %v3114_v37 = vmax.f32 %v3046_v30, 0.0  ;;  %v3063_v38 = vadd.f32 %v3686_v34, %v4794_v51  ;;  %v2892_v39 = vpop.f32.mrb[27].mxu0  ;;  %v3214_v15 = vpop.permute.xlu1 %3213 }
 0x247   :  { %v3080_v40 = vmax.f32 %v3012_v33, 0.0  ;;  %v3029_v41 = vadd.f32 %v4779_v21, %v2892_v39  ;;  %v4057_v21 = vld [vmem:[%s4901_s3 + $0x8] sm:$0xff]   ;;  %s4128_s3 = smov [#allocation5]  }
 0x248   :  { %v3191_v42 = vmax.f32 %v3187_v36, %v3130_v32  ;;  %v4858_v43 = vmax.f32 %v3190_v35, %v3114_v37  ;;  %v3131_v44 = vmax.f32 %v3063_v38, 0.0  ;;  %s3437_s5 = sshll.u32 %s4128_s3, 4  ;;  %s3438_s5 = int_to_ptr.vmem [resolvable:$true] %s3437_s5 }
 0x249   :  { %v4860_v45 = vmax.f32 %v3188_v59, %v3080_v40  ;;  %v3097_v27 = vmax.f32 %v3029_v41, 0.0  ;;  %v3219_v18 = vpop.permute.xlu0 %3218  ;;  %s4098_s0 = scalar_lea.vmem %s3438_s5, 512  ;;  %p4103_p9 = scmp.lt.s32.totalorder %s3438_s5, %s3438_s5 }
 0x24a   :  { %v4862_v46 = vmax.f32 %v3191_v42, %v3131_v44  ;;  %v3224_v20 = vpop.permute.xlu1 %3223  ;;  %p4099_p8 = scmp.ne.s32.totalorder %s3438_s5, %s4098_s0  ;;  %p4104_p10 = scmp.lt.s32.totalorder %s4098_s0, %s4098_s0 }
 0x24b   :  { %v4864_v11 = vmax.f32 %v3189_v14, %v3097_v27 }
 0x24c   :  { %v3197_v51 = vpack.c.bf16 %v4862_v46, %v4858_v43  ;;  %p4105_p11 = por %p4104_p10, %p4103_p9 }
 0x24d   :  { %v3196_v47 = vpack.c.bf16 %v4864_v11, %v4860_v45 }
 0x24e   :  { %p4106_p12 = pnand %p4105_p11, %p4099_p8 }
 0x24f   :  { %3687 = vmatprep.subr.bf16.mxu1 %v3196_v47 }
 0x250   :  { %3688 = vmatpush3.bf16.msra.mxu1 %v3196_v47 }
 0x251   :  { %3689 = vmatprep.subr.bf16.mxu1 %v3197_v51 }
 0x254   :  { %3690 = vmatpush3.bf16.msra.mxu1 %v3197_v51 }
 0x255   :  { %3695 = vmatprep.subr.bf16.mxu1 %v3196_v47 }
 0x257   :  { %3692 = vmatmul.mubr.msk.bf16.vlgmr.msra.gmra.mrb[40].mxu1 %vm277_vm0, %v4057_v21 }
 0x258   :  { %3696 = vmatpush3.bf16.msra.mxu1 %v3196_v47  ;;  %3699 = vmatprep.mubr.msk.bf16.mxu1 %vm277_vm0, %v4058_v48 }
 0x259   :  { %3697 = vmatprep.subr.bf16.mxu1 %v3197_v51 }
 0x25c   :  { %3698 = vmatpush3.bf16.msra.mxu1 %v3197_v51 }
 0x25f   :  { %3700 = vmatmul.mubr.msk.bf16.vlgmr.msra.gmra.mrb[44].mxu1 %vm277_vm0, %v4059_v49 }
 0x32a   :  { %v3693_v50 = vpop.f32.mrb[40].mxu1 }
 0x32b   :  { %v3276_v52 = vpop.f32.mrb[41].mxu1  ;;  %v3285_v19 = vadd.f32 %v3693_v50, %v3219_v18 }
 0x32c   :  { %v3694_v54 = vpop.f32.mrb[42].mxu1  ;;  %v3277_v22 = vadd.f32 %v3276_v52, %v3209_v0 }
 0x32d   :  { %v3279_v55 = vpop.f32.mrb[43].mxu1  ;;  %v3288_v23 = vadd.f32 %v3694_v54, %v3224_v20  ;;  %v3293_v25 = vmax.f32 %v3285_v19, 0.0 }
 0x32e   :  { %v3280_v24 = vadd.f32 %v3279_v55, %v3214_v15  ;;  %v3291_v28 = vmax.f32 %v3277_v22, 0.0 }
 0x32f   :  { %v3294_v30 = vmax.f32 %v3288_v23, 0.0 }
 0x330   :  { %v3292_v34 = vmax.f32 %v3280_v24, 0.0 }
 0x332   :  { %v3701_v62 = vpop.f32.mrb[44].mxu1 }
 0x333   :  { %v3382_v57 = vadd.f32 %v3701_v62, %v3316_v61  ;;  %v3373_v63 = vpop.f32.mrb[45].mxu1 }
 0x334   :  { %v3374_v3 = vadd.f32 %v3373_v63, %v3306_v53  ;;  %v3702_v58 = vpop.f32.mrb[46].mxu1 }
 0x335   :  { %v3617_v5 = vmul.f32 -1.442695, %v3382_v57  ;;  %v3385_v7 = vadd.f32 %v3702_v58, %v3321_v1  ;;  %v3376_v9 = vpop.f32.mrb[47].mxu1 }
 0x336   :  { %v3615_v2 = vmul.f32 -1.442695, %v3374_v3  ;;  %v3377_v4 = vadd.f32 %v3376_v9, %v3311_v56 }
 0x337   :  { %4060 = vpow2.f32 %v3617_v5  ;;  %v3618_v59 = vmul.f32 -1.442695, %v3385_v7 }
 0x338   :  { %4062 = vpow2.f32 %v3615_v2  ;;  %v3616_v6 = vmul.f32 -1.442695, %v3377_v4 }
 0x339   :  { %4064 = vpow2.f32 %v3618_v59 }
 0x33a   :  { %4066 = vpow2.f32 %v3616_v6 }
 0x341   :  { %v4061_v8 = vpop.eup %4060 }
 0x342   :  { %v4063_v10 = vpop.eup %4062  ;;  %v3402_v12 = vadd.f32 1.0, %v4061_v8 }
 0x343   :  { %v4065_v13 = vpop.eup %4064  ;;  %v3400_v60 = vadd.f32 1.0, %v4063_v10 }
 0x344   :  { %v4067_v14 = vpop.eup %4066  ;;  %4068 = vrcp.f32 %v3402_v12  ;;  %v3403_v16 = vadd.f32 1.0, %v4065_v13 }
 0x345   :  { %4070 = vrcp.f32 %v3400_v60  ;;  %v3401_v17 = vadd.f32 1.0, %v4067_v14 }
 0x346   :  { %4072 = vrcp.f32 %v3403_v16 }
 0x347   :  { %4074 = vrcp.f32 %v3401_v17 }
 0x34e   :  { %v4069_v26 = vpop.eup %4068 }
 0x34f   :  { %v4071_v29 = vpop.eup %4070  ;;  %v3414_v31 = vmul.f32 %v4069_v26, %v3293_v25  ;;  %v3418_v32 = vsub.f32 1.0, %v4069_v26 }
 0x350   :  { %v4073_v33 = vpop.eup %4072  ;;  %v3412_v35 = vmul.f32 %v4071_v29, %v3291_v28  ;;  %v3416_v36 = vsub.f32 1.0, %v4071_v29 }
 0x351   :  { %v4075_v37 = vpop.eup %4074  ;;  %v3422_v38 = vmul.f32 %v3418_v32, %v4858_v43  ;;  %v3415_v39 = vmul.f32 %v4073_v33, %v3294_v30  ;;  %v3419_v40 = vsub.f32 1.0, %v4073_v33 }
 0x352   :  { %v3420_v41 = vmul.f32 %v3416_v36, %v4860_v45  ;;  %v3413_v42 = vmul.f32 %v4075_v37, %v3292_v34  ;;  %v3417_v44 = vsub.f32 1.0, %v4075_v37 }
 0x353   :  { %v3423_v27 = vmul.f32 %v3419_v40, %v4862_v46  ;;  %v3426_v47 = vadd.f32 %v3422_v38, %v3414_v31 }
 0x354   :  { %v3421_v51 = vmul.f32 %v3417_v44, %v4864_v11  ;;  %v3424_v21 = vadd.f32 %v3420_v41, %v3412_v35 }
 0x355   :  { %v3427_v48 = vadd.f32 %v3423_v27, %v3415_v39  ;;  %3430 = vst [vmem:[#allocation5 + $0x10] sm:$0xff] %v3426_v47 }
 0x356   :  { %v3425_v49 = vadd.f32 %v3421_v51, %v3413_v42  ;;  %3428 = vst [vmem:[#allocation5] sm:$0xff] %v3424_v21 }
 0x357   :  { %3431 = vst [vmem:[#allocation5 + $0x18] sm:$0xff] %v3427_v48 }
 0x358   :  { %3429 = vst [vmem:[#allocation5 + $0x8] sm:$0xff] %v3425_v49 }
 0x359   :  { %4109 = shalt.err (!%p4106_p12)
}
 0x35a   :  { %s4110_s2 = scalar_lea.hbm %s4905_s7, 512 }
 0x35b   :  { %p4111_p13 = scmp.ne.s32.totalorder %s4905_s7, %s4110_s2  ;;  %p4114_p0 = scmp.lt.u32.totalorder %s4110_s2, %s4905_s7 }
 0x35d   :  { %p4116_p1 = pnand %p4114_p0, %p4111_p13 }
 0x35f   :  { %4119 = shalt.err (!%p4116_p1)
}
 0x360   :  { %s4129_s21 = smov 128   ;;  %s4130_s22 = smov 8  }
 0x361   :  { %3443 = dma.vmem_to_hbm [thread:$0]  %s3438_s5, 512, %s4905_s7, [#allocation4], %s4129_s21, %s4129_s21, %s4130_s22  }
 0x362   :  { %4122 = dma.done.wait [#allocation4], 512  }
 0x363   :  { %4123 = vsyncadd [#allocation4], 4294966784 }
 0x364   :  { %3447 = vsyncpa [#allocation3], 1 }
 0x365   :  { %3448 = vsyncpa [#allocation4], 1 }

</bundles_post_ra>
